<compile_context>
chip_gen: v6e
topology: v6e:2x2x1
jax: 0.10.0
libtpu: 0.0.40
codegen_flags: <defaults>
</compile_context>

<pallas_src>
import jax
import jax.numpy as jnp
from jax.experimental import pallas as pl
from jax.experimental.pallas import tpu as pltpu

NUM_BRANCHES = 4          # kernels = [1, 3, 5, 7]
KERNELS = (1, 3, 5, 7)
BN_EPS = 1e-5
MIB = 1024 * 1024

# pl.reciprocal(approx=True) would move the softmax divide onto the EUP vrcp
# slot (free w.r.t. the VALU tail); kept exact so the 1e-4 f32 allclose check
# below is deterministic.  Flip after validating on-silicon.
_APPROX_RECIPROCAL = False


# ---------------------------------------------------------------------------
# Kernel
# ---------------------------------------------------------------------------
def _sk_kernel(x_ref, wconv_ref, bconv_ref, wse_ref, bse_ref, out_ref):
    C = out_ref.shape[-1]
    x = x_ref[...]                                    # [TB, C] f32

    # ---- 4 "conv" branches fused into one wide MXU pass (BN/bias pre-folded).
    # astype() is a no-op for f32 weights and enables a native-bf16 MXU path
    # when fold_params() packs the weight slabs as bf16.
    feats_all = jnp.dot(x.astype(wconv_ref.dtype), wconv_ref[...],
                        preferred_element_type=jnp.float32)
    feats_all = jnp.maximum(feats_all + bconv_ref[...], 0.0)        # ReLU, [TB, 4C]
    # static, 128-lane-aligned slices -> the 4 branch feature maps
    feats = [feats_all[:, k * C:(k + 1) * C] for k in range(NUM_BRANCHES)]

    # ---- fuse: U = sum of branches; spatial mean over 1x1 is the identity ---
    u = (feats[0] + feats[1]) + (feats[2] + feats[3])               # [TB, C]

    # ---- squeeze + excitation folded into one full-K, lane-dense matmul -----
    logits_all = jnp.dot(u.astype(wse_ref.dtype), wse_ref[...],
                         preferred_element_type=jnp.float32)
    logits_all = logits_all + bse_ref[...]                          # [TB, 4C]
    logits = [logits_all[:, k * C:(k + 1) * C] for k in range(NUM_BRANCHES)]

    # ---- softmax over the branch axis (dim=0 in the PyTorch code) -----------
    m = jnp.maximum(jnp.maximum(logits[0], logits[1]),
                    jnp.maximum(logits[2], logits[3]))
    exps = [jnp.exp(l - m) for l in logits]
    denom = (exps[0] + exps[1]) + (exps[2] + exps[3])
    inv = pl.reciprocal(denom, approx=_APPROX_RECIPROCAL)

    # ---- weighted sum of branch features ------------------------------------
    v = (exps[0] * feats[0] + exps[1] * feats[1] +
         exps[2] * feats[2] + exps[3] * feats[3]) * inv
    out_ref[...] = v.astype(out_ref.dtype)


# ---------------------------------------------------------------------------
# Wrapper
# ---------------------------------------------------------------------------
def _vmem_capacity_bytes():
    """Per-TensorCore VMEM capacity; conservative fallback if query fails."""
    try:
        return int(pltpu.get_tpu_info().vmem_capacity_bytes)
    except Exception:
        return 128 * MIB          # v5e / v6e


def _pick_batch_tile(B, prefer_multi_step):
    """Largest multiple-of-8 tile that divides B (optionally requiring >=2 steps)."""
    tb = B
    for cand in (256, 128, 64, 32, 16, 8):
        if B % cand != 0:
            continue
        if prefer_multi_step and B // cand < 2:
            continue
        tb = cand
        break
    return tb


def _build_call(B, C, TB, w_dtype, single_buffer_weights, v7x_like):
    C4 = NUM_BRANCHES * C
    grid = (B // TB,)

    w_kwargs = {}
    if single_buffer_weights:
        # Grid-invariant operands: one buffer is enough; default double-buffering
        # would waste ~2 * (2*C*4C*itemsize) bytes of VMEM for data that never
        # changes across the grid.
        w_kwargs["pipeline_mode"] = pl.Buffered(1)

    in_specs = [
        pl.BlockSpec((TB, C), lambda i: (i, 0)),                 # x (tiled over batch)
        pl.BlockSpec((C, C4), lambda i: (0, 0), **w_kwargs),     # folded conv weights
        pl.BlockSpec((1, C4), lambda i: (0, 0), **w_kwargs),     # folded conv bias
        pl.BlockSpec((C, C4), lambda i: (0, 0), **w_kwargs),     # folded SE weights
        pl.BlockSpec((1, C4), lambda i: (0, 0), **w_kwargs),     # folded SE bias
    ]
    out_spec = pl.BlockSpec((TB, C), lambda i: (i, 0))

    # VMEM estimate: streamed x/out tiles (double-buffered), the two weight
    # slabs + bias rows (1 or 2 buffers), and the elementwise intermediates
    # (feats_all / logits_all / exps / products ~ 8 x [TB, 4C] f32).
    wbytes = jnp.dtype(w_dtype).itemsize
    n_wbuf = 1 if single_buffer_weights else 2
    est_bytes = (2 * TB * C * 4                      # x
                 + 2 * TB * C * 4                    # out
                 + n_wbuf * 2 * C * C4 * wbytes      # weight slabs
                 + n_wbuf * 2 * C4 * 4               # bias rows
                 + 8 * TB * C4 * 4)                  # kernel intermediates

    compiler_kwargs = dict(dimension_semantics=("parallel",))
    if est_bytes > 16 * MIB:          # v5e default scoped limit (v6e/v7x: 32 MiB)
        # v7x: stay well under the 64 MiB physical VMEM (headroom for compiler
        # scratch / DMA descriptors).  v5e/v6e: 128 MiB physical, allow more.
        ceiling = 56 * MIB if v7x_like else 100 * MIB
        compiler_kwargs["vmem_limit_bytes"] = min(int(est_bytes * 3 // 2), ceiling)

    return pl.pallas_call(
        _sk_kernel,
        out_shape=jax.ShapeDtypeStruct((B, C), jnp.float32),
        grid_spec=pl.GridSpec(grid=grid, in_specs=in_specs, out_specs=out_spec),
        compiler_params=pltpu.CompilerParams(**compiler_kwargs),
    )


# Probed once: whether this jax version accepts pipeline_mode=pl.Buffered(1) on
# the grid-invariant operands.  Falls back to default buffering if not.
_SINGLE_BUFFER_WEIGHTS_OK = None


def local_stage2_forward(x, kp):
    """x: [B, C] float32 (the module's [B, C, 1, 1] squeezed).  Returns [B, C]."""
    global _SINGLE_BUFFER_WEIGHTS_OK
    B, C = x.shape
    C4 = NUM_BRANCHES * C
    assert C % 128 == 0, (
        "C must be a multiple of 128 so the per-branch column slices land on "
        "128-lane boundaries (otherwise each slice materializes a VMEM copy)")
    assert kp["w_conv_all"].shape == (C, C4)
    assert kp["w_se_all"].shape == (C, C4)

    vmem_cap = _vmem_capacity_bytes()
    v7x_like = vmem_cap <= 64 * MIB   # v7x: 64 MiB/TC, 2 TCs.  v5e/v6e: 128 MiB, 1 TC.
    # v7x: prefer >=2 grid steps (B>=16) so the "parallel" batch axis shards
    # across both TensorCores and pipelines the x/out streams.  v5e/v6e: the
    # grid is a serial loop on one TC, so keep the biggest tile.
    TB = _pick_batch_tile(B, prefer_multi_step=(v7x_like and B >= 16))

    w_dtype = kp["w_conv_all"].dtype
    args = (x, kp["w_conv_all"], kp["b_conv_all"], kp["w_se_all"], kp["b_se_all"])

    if _SINGLE_BUFFER_WEIGHTS_OK is None:
        try:
            out = jax.block_until_ready(
                _build_call(B, C, TB, w_dtype, True, v7x_like)(*args))
            _SINGLE_BUFFER_WEIGHTS_OK = True
            return out
        except Exception:
            _SINGLE_BUFFER_WEIGHTS_OK = False
    return _build_call(B, C, TB, w_dtype, _SINGLE_BUFFER_WEIGHTS_OK, v7x_like)(*args)


# ---------------------------------------------------------------------------
# Synthetic "PyTorch-like" parameters + host-side folding
# ---------------------------------------------------------------------------
def make_raw_params(key, C):
    """Parameters matching Local_stage1(channel=C, reduction=C/4), eval-mode BN."""
    D = max(32, int(C // (C / 4.0)))                  # = 32
    keys = iter(jax.random.split(key, 64))
    branches = []
    for k in KERNELS:
        conv_w = jax.random.normal(next(keys), (C, C, k, k), jnp.float32) * 0.05  # [out,in,k,k]
        conv_b = jax.random.normal(next(keys), (C,), jnp.float32) * 0.05
        gamma = 1.0 + 0.1 * jax.random.normal(next(keys), (C,), jnp.float32)
        beta = 0.1 * jax.random.normal(next(keys), (C,), jnp.float32)
        running_mean = 0.1 * jax.random.normal(next(keys), (C,), jnp.float32)
        running_var = 1.0 + 0.1 * jnp.abs(jax.random.normal(next(keys), (C,), jnp.float32))
        branches.append(dict(conv_w=conv_w, conv_b=conv_b, gamma=gamma, beta=beta,
                             running_mean=running_mean, running_var=running_var,
                             ksize=k))
    fc_w = jax.random.normal(next(keys), (D, C), jnp.float32) * 0.05   # Linear(C->D): [out,in]
    fc_b = jax.random.normal(next(keys), (D,), jnp.float32) * 0.05
    fcs_w = [jax.random.normal(next(keys), (C, D), jnp.float32) * 0.05 for _ in KERNELS]
    fcs_b = [jax.random.normal(next(keys), (C,), jnp.float32) * 0.05 for _ in KERNELS]
    return dict(branches=branches, fc_w=fc_w, fc_b=fc_b,
                fcs_w=fcs_w, fcs_b=fcs_b, d=D)


def fold_params(raw, weights_dtype=jnp.float32):
    """Fold conv-bias + BN into the conv weights, fc into fcs, concat branches.

    weights_dtype=jnp.bfloat16 halves weight HBM/VMEM and uses the MXU's native
    bf16 path (activations stay f32 and are cast at the dot); default f32 keeps
    the 1e-4 correctness check exact.
    """
    fc_wT = raw["fc_w"].T                              # [C, D]
    fc_b = raw["fc_b"]                                 # [D]
    w_conv_cols, b_conv_cols, w_se_cols, b_se_cols = [], [], [], []
    for br, wk, bk in zip(raw["branches"], raw["fcs_w"], raw["fcs_b"]):
        k = br["ksize"]
        w_center = br["conv_w"][:, :, k // 2, k // 2].T          # [in, out]
        scale = br["gamma"] / jnp.sqrt(br["running_var"] + BN_EPS)
        shift = br["beta"] - br["running_mean"] * scale
        w_conv_cols.append(w_center * scale[None, :])            # BN scale folded into columns
        b_conv_cols.append(br["conv_b"] * scale + shift)         # conv bias + BN shift folded
        wkT = wk.T                                               # [D, C]
        w_se_cols.append(fc_wT @ wkT)                            # [C, C]
        b_se_cols.append(fc_b @ wkT + bk)                        # [C]
    return dict(
        w_conv_all=jnp.concatenate(w_conv_cols, axis=1).astype(weights_dtype),   # [C, 4C]
        b_conv_all=jnp.concatenate(b_conv_cols, axis=0)[None, :],                # [1, 4C] f32
        w_se_all=jnp.concatenate(w_se_cols, axis=1).astype(weights_dtype),       # [C, 4C]
        b_se_all=jnp.concatenate(b_se_cols, axis=0)[None, :],                    # [1, 4C] f32
    )


# ---------------------------------------------------------------------------
# Pure-JAX reference of the ORIGINAL (unfolded) math, for the sanity check
# ---------------------------------------------------------------------------
def reference_forward(x, raw):
    feats = []
    for br in raw["branches"]:
        k = br["ksize"]
        w_center = br["conv_w"][:, :, k // 2, k // 2]            # [out, in]
        y = x @ w_center.T + br["conv_b"]
        y = ((y - br["running_mean"])
             * (br["gamma"] / jnp.sqrt(br["running_var"] + BN_EPS))
             + br["beta"])                                       # BN, eval mode
        feats.append(jnp.maximum(y, 0.0))                        # ReLU
    feats = jnp.stack(feats, 0)                                  # [4, B, C]
    u = feats.sum(0)                                             # U; spatial mean is identity
    z = u @ raw["fc_w"].T + raw["fc_b"]                          # [B, D]
    logits = jnp.stack([z @ w.T + b for w, b in zip(raw["fcs_w"], raw["fcs_b"])], 0)
    attn = jax.nn.softmax(logits, axis=0)                        # softmax over branches
    return (attn * feats).sum(0)                                 # [B, C]


if __name__ == "__main__":
    B, C = 8, 128                                      # in_ch = 128 -> d = 32
    key = jax.random.PRNGKey(0)
    k_x, k_p = jax.random.split(key)

    # input to Local_stage2: anything viewable as [B, C]; use [B, C] directly
    x = jax.random.normal(k_x, (B, C), jnp.float32)
    raw = make_raw_params(k_p, C)
    kp = fold_params(raw)                              # f32 weights for the 1e-4 check

    out = local_stage2_forward(x, kp)
    out = jax.block_until_ready(out)

    ref = reference_forward(x, raw)
    assert out.shape == (B, C)
    assert jnp.allclose(out, ref, atol=1e-4, rtol=1e-4), "mismatch vs JAX reference"

    print("KERNEL_OK")
</pallas_src>

<mosaic_0001>
module attributes {stable_mosaic.version = 11 : i64} {
  func.func @_sk_kernel(%arg0: i32, %arg1: memref<8x128xf32, #tpu.memory_space<vmem>>, %arg2: memref<128x512xf32, #tpu.memory_space<vmem>>, %arg3: memref<1x512xf32, #tpu.memory_space<vmem>>, %arg4: memref<128x512xf32, #tpu.memory_space<vmem>>, %arg5: memref<1x512xf32, #tpu.memory_space<vmem>>, %arg6: memref<8x128xf32, #tpu.memory_space<vmem>>) attributes {dimension_semantics = [#tpu.dimension_semantics<parallel>], iteration_bounds = array<i64: 1>, scalar_prefetch = 0 : i64, scratch_operands = 0 : i64, tpu.core_type = #tpu.core_type<tc>, window_params = [{transform_indices = @transform_0, window_bounds = array<i64: 8, 128>}, {pipeline_mode = #tpu.pipeline_mode<synchronous>, transform_indices = @transform_1, window_bounds = array<i64: 128, 512>}, {pipeline_mode = #tpu.pipeline_mode<synchronous>, transform_indices = @transform_2, window_bounds = array<i64: 1, 512>}, {pipeline_mode = #tpu.pipeline_mode<synchronous>, transform_indices = @transform_3, window_bounds = array<i64: 128, 512>}, {pipeline_mode = #tpu.pipeline_mode<synchronous>, transform_indices = @transform_4, window_bounds = array<i64: 1, 512>}, {transform_indices = @transform_5, window_bounds = array<i64: 8, 128>}]} {
    %c0 = arith.constant 0 : index
    %c0_0 = arith.constant 0 : index
    %0 = vector.load %arg1[%c0, %c0_0] : memref<8x128xf32, #tpu.memory_space<vmem>>, vector<8x128xf32>
    %c0_1 = arith.constant 0 : index
    %c0_2 = arith.constant 0 : index
    %1 = vector.load %arg2[%c0_1, %c0_2] : memref<128x512xf32, #tpu.memory_space<vmem>>, vector<128x512xf32>
    %cst = arith.constant dense<0.000000e+00> : vector<8x512xf32>
    %2 = tpu.matmul %0, %1, %cst {dimension_numbers = #tpu.dot_dimension_numbers<[1], [0], [0], [1], [0, 0, 1, 1], [], []>} : vector<8x128xf32>, vector<128x512xf32>, vector<8x512xf32> -> vector<8x512xf32>
    %c0_3 = arith.constant 0 : index
    %c0_4 = arith.constant 0 : index
    %3 = vector.load %arg3[%c0_3, %c0_4] : memref<1x512xf32, #tpu.memory_space<vmem>>, vector<1x512xf32>
    %4 = vector.broadcast %3 : vector<1x512xf32> to vector<8x512xf32>
    %5 = arith.addf %2, %4 : vector<8x512xf32>
    %cst_5 = arith.constant 0.000000e+00 : f32
    %6 = vector.broadcast %cst_5 : f32 to vector<8x512xf32>
    %7 = arith.maximumf %5, %6 : vector<8x512xf32>
    %8 = vector.extract_strided_slice %7 {offsets = [0, 0], sizes = [8, 128], strides = [1, 1]} : vector<8x512xf32> to vector<8x128xf32>
    %9 = vector.extract_strided_slice %7 {offsets = [0, 128], sizes = [8, 128], strides = [1, 1]} : vector<8x512xf32> to vector<8x128xf32>
    %10 = vector.extract_strided_slice %7 {offsets = [0, 256], sizes = [8, 128], strides = [1, 1]} : vector<8x512xf32> to vector<8x128xf32>
    %11 = vector.extract_strided_slice %7 {offsets = [0, 384], sizes = [8, 128], strides = [1, 1]} : vector<8x512xf32> to vector<8x128xf32>
    %12 = arith.addf %8, %9 : vector<8x128xf32>
    %13 = arith.addf %10, %11 : vector<8x128xf32>
    %14 = arith.addf %12, %13 : vector<8x128xf32>
    %c0_6 = arith.constant 0 : index
    %c0_7 = arith.constant 0 : index
    %15 = vector.load %arg4[%c0_6, %c0_7] : memref<128x512xf32, #tpu.memory_space<vmem>>, vector<128x512xf32>
    %cst_8 = arith.constant dense<0.000000e+00> : vector<8x512xf32>
    %16 = tpu.matmul %14, %15, %cst_8 {dimension_numbers = #tpu.dot_dimension_numbers<[1], [0], [0], [1], [0, 0, 1, 1], [], []>} : vector<8x128xf32>, vector<128x512xf32>, vector<8x512xf32> -> vector<8x512xf32>
    %c0_9 = arith.constant 0 : index
    %c0_10 = arith.constant 0 : index
    %17 = vector.load %arg5[%c0_9, %c0_10] : memref<1x512xf32, #tpu.memory_space<vmem>>, vector<1x512xf32>
    %18 = vector.broadcast %17 : vector<1x512xf32> to vector<8x512xf32>
    %19 = arith.addf %16, %18 : vector<8x512xf32>
    %20 = vector.extract_strided_slice %19 {offsets = [0, 0], sizes = [8, 128], strides = [1, 1]} : vector<8x512xf32> to vector<8x128xf32>
    %21 = vector.extract_strided_slice %19 {offsets = [0, 128], sizes = [8, 128], strides = [1, 1]} : vector<8x512xf32> to vector<8x128xf32>
    %22 = vector.extract_strided_slice %19 {offsets = [0, 256], sizes = [8, 128], strides = [1, 1]} : vector<8x512xf32> to vector<8x128xf32>
    %23 = vector.extract_strided_slice %19 {offsets = [0, 384], sizes = [8, 128], strides = [1, 1]} : vector<8x512xf32> to vector<8x128xf32>
    %24 = arith.maximumf %20, %21 : vector<8x128xf32>
    %25 = arith.maximumf %22, %23 : vector<8x128xf32>
    %26 = arith.maximumf %24, %25 : vector<8x128xf32>
    %27 = arith.subf %20, %26 : vector<8x128xf32>
    %28 = math.exp %27 : vector<8x128xf32>
    %29 = arith.subf %21, %26 : vector<8x128xf32>
    %30 = math.exp %29 : vector<8x128xf32>
    %31 = arith.subf %22, %26 : vector<8x128xf32>
    %32 = math.exp %31 : vector<8x128xf32>
    %33 = arith.subf %23, %26 : vector<8x128xf32>
    %34 = math.exp %33 : vector<8x128xf32>
    %35 = arith.addf %28, %30 : vector<8x128xf32>
    %36 = arith.addf %32, %34 : vector<8x128xf32>
    %37 = arith.addf %35, %36 : vector<8x128xf32>
    %38 = tpu.reciprocal %37 : vector<8x128xf32> -> vector<8x128xf32>
    %39 = arith.mulf %28, %8 : vector<8x128xf32>
    %40 = arith.mulf %30, %9 : vector<8x128xf32>
    %41 = arith.addf %39, %40 : vector<8x128xf32>
    %42 = arith.mulf %32, %10 : vector<8x128xf32>
    %43 = arith.addf %41, %42 : vector<8x128xf32>
    %44 = arith.mulf %34, %11 : vector<8x128xf32>
    %45 = arith.addf %43, %44 : vector<8x128xf32>
    %46 = arith.mulf %45, %38 : vector<8x128xf32>
    %c0_11 = arith.constant 0 : index
    %c0_12 = arith.constant 0 : index
    %47 = vector.load %arg6[%c0_11, %c0_12] : memref<8x128xf32, #tpu.memory_space<vmem>>, vector<8x128xf32>
    tpu.vector_store %arg6[%c0_11, %c0_12], %46 {strides = array<i32>} : memref<8x128xf32, #tpu.memory_space<vmem>>, vector<8x128xf32>,
    return
  }
  func.func @transform_0(%arg0: i32) -> (i32, i32) {
    %c0_i32 = arith.constant 0 : i32
    %c0_i32_0 = arith.constant 0 : i32
    return %arg0, %c0_i32 : i32, i32
  }
  func.func @transform_1(%arg0: i32) -> (i32, i32) {
    %c0_i32 = arith.constant 0 : i32
    %c0_i32_0 = arith.constant 0 : i32
    %c0_i32_1 = arith.constant 0 : i32
    return %c0_i32, %c0_i32_0 : i32, i32
  }
  func.func @transform_2(%arg0: i32) -> (i32, i32) {
    %c0_i32 = arith.constant 0 : i32
    %c0_i32_0 = arith.constant 0 : i32
    %c0_i32_1 = arith.constant 0 : i32
    return %c0_i32, %c0_i32_0 : i32, i32
  }
  func.func @transform_3(%arg0: i32) -> (i32, i32) {
    %c0_i32 = arith.constant 0 : i32
    %c0_i32_0 = arith.constant 0 : i32
    %c0_i32_1 = arith.constant 0 : i32
    return %c0_i32, %c0_i32_0 : i32, i32
  }
  func.func @transform_4(%arg0: i32) -> (i32, i32) {
    %c0_i32 = arith.constant 0 : i32
    %c0_i32_0 = arith.constant 0 : i32
    %c0_i32_1 = arith.constant 0 : i32
    return %c0_i32, %c0_i32_0 : i32, i32
  }
  func.func @transform_5(%arg0: i32) -> (i32, i32) {
    %c0_i32 = arith.constant 0 : i32
    %c0_i32_0 = arith.constant 0 : i32
    return %arg0, %c0_i32 : i32, i32
  }
}

module attributes {stable_mosaic.version = 11 : i64} {
  func.func @_sk_kernel(%arg0: i32, %arg1: memref<8x128xf32, #tpu.memory_space<vmem>>, %arg2: memref<128x512xf32, #tpu.memory_space<vmem>>, %arg3: memref<1x512xf32, #tpu.memory_space<vmem>>, %arg4: memref<128x512xf32, #tpu.memory_space<vmem>>, %arg5: memref<1x512xf32, #tpu.memory_space<vmem>>, %arg6: memref<8x128xf32, #tpu.memory_space<vmem>>) attributes {dimension_semantics = [#tpu.dimension_semantics<parallel>], iteration_bounds = array<i64: 1>, scalar_prefetch = 0 : i64, scratch_operands = 0 : i64, tpu.core_type = #tpu.core_type<tc>, window_params = [{transform_indices = @transform_0, window_bounds = array<i64: 8, 128>}, {pipeline_mode = #tpu.pipeline_mode<synchronous>, transform_indices = @transform_1, window_bounds = array<i64: 128, 512>}, {pipeline_mode = #tpu.pipeline_mode<synchronous>, transform_indices = @transform_2, window_bounds = array<i64: 1, 512>}, {pipeline_mode = #tpu.pipeline_mode<synchronous>, transform_indices = @transform_3, window_bounds = array<i64: 128, 512>}, {pipeline_mode = #tpu.pipeline_mode<synchronous>, transform_indices = @transform_4, window_bounds = array<i64: 1, 512>}, {transform_indices = @transform_5, window_bounds = array<i64: 8, 128>}]} {
    %c0 = arith.constant 0 : index
    %c0_0 = arith.constant 0 : index
    %0 = vector.load %arg1[%c0, %c0_0] : memref<8x128xf32, #tpu.memory_space<vmem>>, vector<8x128xf32>
    %c0_1 = arith.constant 0 : index
    %c0_2 = arith.constant 0 : index
    %1 = vector.load %arg2[%c0_1, %c0_2] : memref<128x512xf32, #tpu.memory_space<vmem>>, vector<128x512xf32>
    %cst = arith.constant dense<0.000000e+00> : vector<8x512xf32>
    %2 = tpu.matmul %0, %1, %cst {dimension_numbers = #tpu.dot_dimension_numbers<[1], [0], [0], [1], [0, 0, 1, 1], [], []>} : vector<8x128xf32>, vector<128x512xf32>, vector<8x512xf32> -> vector<8x512xf32>
    %c0_3 = arith.constant 0 : index
    %c0_4 = arith.constant 0 : index
    %3 = vector.load %arg3[%c0_3, %c0_4] : memref<1x512xf32, #tpu.memory_space<vmem>>, vector<1x512xf32>
    %4 = vector.broadcast %3 : vector<1x512xf32> to vector<8x512xf32>
    %5 = arith.addf %2, %4 : vector<8x512xf32>
    %cst_5 = arith.constant 0.000000e+00 : f32
    %6 = vector.broadcast %cst_5 : f32 to vector<8x512xf32>
    %7 = arith.maximumf %5, %6 : vector<8x512xf32>
    %8 = vector.extract_strided_slice %7 {offsets = [0, 0], sizes = [8, 128], strides = [1, 1]} : vector<8x512xf32> to vector<8x128xf32>
    %9 = vector.extract_strided_slice %7 {offsets = [0, 128], sizes = [8, 128], strides = [1, 1]} : vector<8x512xf32> to vector<8x128xf32>
    %10 = vector.extract_strided_slice %7 {offsets = [0, 256], sizes = [8, 128], strides = [1, 1]} : vector<8x512xf32> to vector<8x128xf32>
    %11 = vector.extract_strided_slice %7 {offsets = [0, 384], sizes = [8, 128], strides = [1, 1]} : vector<8x512xf32> to vector<8x128xf32>
    %12 = arith.addf %8, %9 : vector<8x128xf32>
    %13 = arith.addf %10, %11 : vector<8x128xf32>
    %14 = arith.addf %12, %13 : vector<8x128xf32>
    %c0_6 = arith.constant 0 : index
    %c0_7 = arith.constant 0 : index
    %15 = vector.load %arg4[%c0_6, %c0_7] : memref<128x512xf32, #tpu.memory_space<vmem>>, vector<128x512xf32>
    %cst_8 = arith.constant dense<0.000000e+00> : vector<8x512xf32>
    %16 = tpu.matmul %14, %15, %cst_8 {dimension_numbers = #tpu.dot_dimension_numbers<[1], [0], [0], [1], [0, 0, 1, 1], [], []>} : vector<8x128xf32>, vector<128x512xf32>, vector<8x512xf32> -> vector<8x512xf32>
    %c0_9 = arith.constant 0 : index
    %c0_10 = arith.constant 0 : index
    %17 = vector.load %arg5[%c0_9, %c0_10] : memref<1x512xf32, #tpu.memory_space<vmem>>, vector<1x512xf32>
    %18 = vector.broadcast %17 : vector<1x512xf32> to vector<8x512xf32>
    %19 = arith.addf %16, %18 : vector<8x512xf32>
    %20 = vector.extract_strided_slice %19 {offsets = [0, 0], sizes = [8, 128], strides = [1, 1]} : vector<8x512xf32> to vector<8x128xf32>
    %21 = vector.extract_strided_slice %19 {offsets = [0, 128], sizes = [8, 128], strides = [1, 1]} : vector<8x512xf32> to vector<8x128xf32>
    %22 = vector.extract_strided_slice %19 {offsets = [0, 256], sizes = [8, 128], strides = [1, 1]} : vector<8x512xf32> to vector<8x128xf32>
    %23 = vector.extract_strided_slice %19 {offsets = [0, 384], sizes = [8, 128], strides = [1, 1]} : vector<8x512xf32> to vector<8x128xf32>
    %24 = arith.maximumf %20, %21 : vector<8x128xf32>
    %25 = arith.maximumf %22, %23 : vector<8x128xf32>
    %26 = arith.maximumf %24, %25 : vector<8x128xf32>
    %27 = arith.subf %20, %26 : vector<8x128xf32>
    %28 = math.exp %27 : vector<8x128xf32>
    %29 = arith.subf %21, %26 : vector<8x128xf32>
    %30 = math.exp %29 : vector<8x128xf32>
    %31 = arith.subf %22, %26 : vector<8x128xf32>
    %32 = math.exp %31 : vector<8x128xf32>
    %33 = arith.subf %23, %26 : vector<8x128xf32>
    %34 = math.exp %33 : vector<8x128xf32>
    %35 = arith.addf %28, %30 : vector<8x128xf32>
    %36 = arith.addf %32, %34 : vector<8x128xf32>
    %37 = arith.addf %35, %36 : vector<8x128xf32>
    %38 = tpu.reciprocal %37 : vector<8x128xf32> -> vector<8x128xf32>
    %39 = arith.mulf %28, %8 : vector<8x128xf32>
    %40 = arith.mulf %30, %9 : vector<8x128xf32>
    %41 = arith.addf %39, %40 : vector<8x128xf32>
    %42 = arith.mulf %32, %10 : vector<8x128xf32>
    %43 = arith.addf %41, %42 : vector<8x128xf32>
    %44 = arith.mulf %34, %11 : vector<8x128xf32>
    %45 = arith.addf %43, %44 : vector<8x128xf32>
    %46 = arith.mulf %45, %38 : vector<8x128xf32>
    %c0_11 = arith.constant 0 : index
    %c0_12 = arith.constant 0 : index
    %47 = vector.load %arg6[%c0_11, %c0_12] : memref<8x128xf32, #tpu.memory_space<vmem>>, vector<8x128xf32>
    tpu.vector_store %arg6[%c0_11, %c0_12], %46 {strides = array<i32>} : memref<8x128xf32, #tpu.memory_space<vmem>>, vector<8x128xf32>,
    return
  }
  func.func @transform_0(%arg0: i32) -> (i32, i32) {
    %c0_i32 = arith.constant 0 : i32
    %c0_i32_0 = arith.constant 0 : i32
    return %arg0, %c0_i32 : i32, i32
  }
  func.func @transform_1(%arg0: i32) -> (i32, i32) {
    %c0_i32 = arith.constant 0 : i32
    %c0_i32_0 = arith.constant 0 : i32
    %c0_i32_1 = arith.constant 0 : i32
    return %c0_i32, %c0_i32_0 : i32, i32
  }
  func.func @transform_2(%arg0: i32) -> (i32, i32) {
    %c0_i32 = arith.constant 0 : i32
    %c0_i32_0 = arith.constant 0 : i32
    %c0_i32_1 = arith.constant 0 : i32
    return %c0_i32, %c0_i32_0 : i32, i32
  }
  func.func @transform_3(%arg0: i32) -> (i32, i32) {
    %c0_i32 = arith.constant 0 : i32
    %c0_i32_0 = arith.constant 0 : i32
    %c0_i32_1 = arith.constant 0 : i32
    return %c0_i32, %c0_i32_0 : i32, i32
  }
  func.func @transform_4(%arg0: i32) -> (i32, i32) {
    %c0_i32 = arith.constant 0 : i32
    %c0_i32_0 = arith.constant 0 : i32
    %c0_i32_1 = arith.constant 0 : i32
    return %c0_i32, %c0_i32_0 : i32, i32
  }
  func.func @transform_5(%arg0: i32) -> (i32, i32) {
    %c0_i32 = arith.constant 0 : i32
    %c0_i32_0 = arith.constant 0 : i32
    return %arg0, %c0_i32 : i32, i32
  }
}

</mosaic_0001>

<bundles_post_ra>
// kernel: tpu_custom_call.1
= control target key start
LH: loop header
LB: loop body
LE: loop exit
PB: predicated region body
PF: predicated region fallthrough
CT: control target
= control target key end

     0   :  { %10 = vsyncpa [#allocation3], 0  ;;  %s773_s0 = inlined_call_operand.hbm [shape: f32[8,128], index: 0, kind: input, shape index: {}]   ;;  %s774_s1 = inlined_call_operand.hbm [shape: f32[128,512], index: 1, kind: input, shape index: {}]   ;;  %s775_s2 = inlined_call_operand.hbm [shape: f32[1,512], index: 2, kind: input, shape index: {}]   ;;  %s776_s3 = inlined_call_operand.hbm [shape: f32[128,512], index: 3, kind: input, shape index: {}]   ;;  %s777_s4 = inlined_call_operand.vmem [shape: f32[1,512], index: 4, kind: input, shape index: {}]   ;;  %s778_s5 = inlined_call_operand.hbm [shape: f32[8,128], index: 5, kind: output, shape index: {}]  }
   0x1   :  { %11 = vsyncpa [#allocation6], 0 }
   0x2   :  { %12 = vsyncpa [#allocation9], 0 }
   0x3   :  { %13 = vsyncpa [#allocation4], 0  ;;  %s707_s18 = smov [#allocation5]  }
   0x4   :  { %s29_s19 = sshll.u32 %s707_s18, 4  ;;  %s30_s19 = int_to_ptr.vmem [resolvable:$true] %s29_s19 }
   0x5   :  { %s607_s20 = scalar_lea.vmem %s30_s19, 8192  ;;  %p612_p1 = scmp.lt.s32.totalorder %s30_s19, %s30_s19 }
   0x6   :  { %p608_p0 = scmp.ne.s32.totalorder %s30_s19, %s607_s20  ;;  %p613_p2 = scmp.lt.s32.totalorder %s607_s20, %s607_s20 }
   0x8   :  { %p614_p3 = por %p613_p2, %p612_p1 }
   0xa   :  { %p615_p4 = pnand %p614_p3, %p608_p0 }
   0xc   :  { %618 = shalt.err (!%p615_p4)
}
   0xd   :  { %s708_s21 = smov 512   ;;  %s709_s22 = smov 32  }
   0xe   :  { %35 = dma.hbm_to_vmem [thread:$0]  %s774_s1, 8192, %s30_s19, [#allocation6], %s708_s21, %s708_s21, %s709_s22  }
   0xf   :  { %s710_s25 = smov [#allocation2]   ;;  %s711_s27 = smov [#allocation7]  }
  0x10   :  { %s20_s26 = sshll.u32 %s710_s25, 4  ;;  %s42_s28 = sshll.u32 %s711_s27, 4  ;;  %s21_s26 = int_to_ptr.vmem [resolvable:$true] %s20_s26  ;;  %s43_s28 = int_to_ptr.vmem [resolvable:$true] %s42_s28 }
  0x11   :  { %s627_s29 = scalar_lea.vmem %s21_s26, 128  ;;  %p632_p6 = scmp.lt.s32.totalorder %s21_s26, %s21_s26 }
  0x12   :  { %p628_p5 = scmp.ne.s32.totalorder %s21_s26, %s627_s29  ;;  %p633_p7 = scmp.lt.s32.totalorder %s627_s29, %s627_s29 }
  0x14   :  { %p634_p8 = por %p633_p7, %p632_p6 }
  0x16   :  { %p635_p9 = pnand %p634_p8, %p628_p5 }
  0x18   :  { %638 = shalt.err (!%p635_p9)
}
  0x19   :  { %23 = dma.hbm_to_vmem [thread:$0]  %s773_s0, 128, %s21_s26, [#allocation3]  }
  0x1a   :  { %s647_s7 = scalar_lea.vmem %s43_s28, 64  ;;  %p652_p11 = scmp.lt.s32.totalorder %s43_s28, %s43_s28 }
  0x1b   :  { %p648_p10 = scmp.ne.s32.totalorder %s43_s28, %s647_s7  ;;  %p653_p12 = scmp.lt.s32.totalorder %s647_s7, %s647_s7 }
  0x1d   :  { %p654_p13 = por %p653_p12, %p652_p11 }
  0x1f   :  { %p655_p0 = pnand %p654_p13, %p648_p10 }
  0x21   :  { %658 = shalt.err (!%p655_p0)
}
  0x22   :  { %45 = dma.hbm_to_vmem [thread:$0]  %s775_s2, 64, %s43_s28, [#allocation6]  }
  0x23   :  { %s712_s9 = smov [#allocation8]  }
  0x24   :  { %s51_s10 = sshll.u32 %s712_s9, 4  ;;  %s52_s10 = int_to_ptr.vmem [resolvable:$true] %s51_s10 }
  0x25   :  { %s667_s11 = scalar_lea.vmem %s52_s10, 8192  ;;  %p672_p2 = scmp.lt.s32.totalorder %s52_s10, %s52_s10 }
  0x26   :  { %p668_p1 = scmp.ne.s32.totalorder %s52_s10, %s667_s11  ;;  %p673_p3 = scmp.lt.s32.totalorder %s667_s11, %s667_s11 }
  0x28   :  { %p674_p4 = por %p673_p3, %p672_p2 }
  0x2a   :  { %p675_p5 = pnand %p674_p4, %p668_p1 }
  0x2c   :  { %678 = shalt.err (!%p675_p5)
}
  0x2d   :  { %57 = dma.hbm_to_vmem [thread:$0]  %s776_s3, 8192, %s52_s10, [#allocation9], %s708_s21, %s708_s21, %s709_s22  }
  0x2e   :  { %699 = dma.done.wait [#allocation3], 128  }
  0x2f   :  { %700 = vsyncadd [#allocation3], 4294967168 }
  0x30   :  { %701 = dma.done.wait [#allocation6], 8256  }
  0x31   :  { %702 = vsyncadd [#allocation6], 4294959040 }
  0x32   :  { %703 = dma.done.wait [#allocation9], 8192  }
  0x33   :  { %704 = vsyncadd [#allocation9], 4294959104  ;;  %v713_v0 = vmov 0.0   ;;  %v134_v1 = vld [vmem:[#allocation5 + $0x1e8] sm:$0xff]  ;;  %v136_v2 = vld [vmem:[#allocation5 + $0x1f8] sm:$0xff] }
  0x34   :  { %223 = vmatprep.mubr.f32.mxu0 %v713_v0  ;;  %294 = vmatprep.mubr.f32.mxu1 %v713_v0  ;;  %v133_v3 = vld [vmem:[#allocation5 + $0x1e0] sm:$0xff]  ;;  %v135_v4 = vld [vmem:[#allocation5 + $0x1f0] sm:$0xff]  ;;  %v130_v5 = vld [vmem:[#allocation5 + $0x1c8] sm:$0xff] }
  0x35   :  { %159 = vmatprep.subr.mxu0 %v134_v1  ;;  %230 = vmatprep.subr.mxu1 %v136_v2  ;;  %v132_v6 = vld [vmem:[#allocation5 + $0x1d8] sm:$0xff]  ;;  %v129_v7 = vld [vmem:[#allocation5 + $0x1c0] sm:$0xff]  ;;  %v131_v8 = vld [vmem:[#allocation5 + $0x1d0] sm:$0xff] }
  0x36   :  { %160 = vmatpush1.msra.mxu0 %v133_v3  ;;  %231 = vmatpush1.msra.mxu1 %v135_v4  ;;  %v126_v9 = vld [vmem:[#allocation5 + $0x1a8] sm:$0xff]  ;;  %v128_v10 = vld [vmem:[#allocation5 + $0x1b8] sm:$0xff]  ;;  %v125_v11 = vld [vmem:[#allocation5 + $0x1a0] sm:$0xff] }
  0x37   :  { %161 = vmatprep.subr.mxu0 %v130_v5  ;;  %232 = vmatprep.subr.mxu1 %v132_v6  ;;  %v127_v12 = vld [vmem:[#allocation5 + $0x1b0] sm:$0xff]  ;;  %v122_v13 = vld [vmem:[#allocation5 + $0x188] sm:$0xff]  ;;  %v124_v14 = vld [vmem:[#allocation5 + $0x198] sm:$0xff] }
  0x38   :  { %162 = vmatpush1.msra.mxu0 %v129_v7  ;;  %233 = vmatpush1.msra.mxu1 %v131_v8  ;;  %v121_v15 = vld [vmem:[#allocation5 + $0x180] sm:$0xff]  ;;  %v123_v16 = vld [vmem:[#allocation5 + $0x190] sm:$0xff]  ;;  %v118_v17 = vld [vmem:[#allocation5 + $0x168] sm:$0xff] }
  0x39   :  { %163 = vmatprep.subr.mxu0 %v126_v9  ;;  %234 = vmatprep.subr.mxu1 %v128_v10  ;;  %v120_v18 = vld [vmem:[#allocation5 + $0x178] sm:$0xff]  ;;  %v117_v19 = vld [vmem:[#allocation5 + $0x160] sm:$0xff]  ;;  %v119_v20 = vld [vmem:[#allocation5 + $0x170] sm:$0xff] }
  0x3a   :  { %164 = vmatpush1.msra.mxu0 %v125_v11  ;;  %235 = vmatpush1.msra.mxu1 %v127_v12  ;;  %v114_v21 = vld [vmem:[#allocation5 + $0x148] sm:$0xff]  ;;  %v116_v22 = vld [vmem:[#allocation5 + $0x158] sm:$0xff]  ;;  %v113_v23 = vld [vmem:[#allocation5 + $0x140] sm:$0xff] }
  0x3b   :  { %165 = vmatprep.subr.mxu0 %v122_v13  ;;  %236 = vmatprep.subr.mxu1 %v124_v14  ;;  %v115_v24 = vld [vmem:[#allocation5 + $0x150] sm:$0xff]  ;;  %v110_v25 = vld [vmem:[#allocation5 + $0x128] sm:$0xff]  ;;  %v112_v26 = vld [vmem:[#allocation5 + $0x138] sm:$0xff] }
  0x3c   :  { %166 = vmatpush1.msra.mxu0 %v121_v15  ;;  %237 = vmatpush1.msra.mxu1 %v123_v16  ;;  %v109_v27 = vld [vmem:[#allocation5 + $0x120] sm:$0xff]  ;;  %v111_v28 = vld [vmem:[#allocation5 + $0x130] sm:$0xff]  ;;  %v106_v29 = vld [vmem:[#allocation5 + $0x108] sm:$0xff] }
  0x3d   :  { %167 = vmatprep.subr.mxu0 %v118_v17  ;;  %238 = vmatprep.subr.mxu1 %v120_v18  ;;  %v108_v30 = vld [vmem:[#allocation5 + $0x118] sm:$0xff]  ;;  %v105_v31 = vld [vmem:[#allocation5 + $0x100] sm:$0xff]  ;;  %v107_v32 = vld [vmem:[#allocation5 + $0x110] sm:$0xff] }
  0x3e   :  { %168 = vmatpush1.msra.mxu0 %v117_v19  ;;  %239 = vmatpush1.msra.mxu1 %v119_v20  ;;  %v102_v33 = vld [vmem:[#allocation5 + $0xe8] sm:$0xff]  ;;  %v104_v34 = vld [vmem:[#allocation5 + $0xf8] sm:$0xff]  ;;  %v101_v35 = vld [vmem:[#allocation5 + $0xe0] sm:$0xff] }
  0x3f   :  { %169 = vmatprep.subr.mxu0 %v114_v21  ;;  %240 = vmatprep.subr.mxu1 %v116_v22  ;;  %v103_v36 = vld [vmem:[#allocation5 + $0xf0] sm:$0xff]  ;;  %v98_v37 = vld [vmem:[#allocation5 + $0xc8] sm:$0xff]  ;;  %v100_v38 = vld [vmem:[#allocation5 + $0xd8] sm:$0xff] }
  0x40   :  { %170 = vmatpush1.msra.mxu0 %v113_v23  ;;  %241 = vmatpush1.msra.mxu1 %v115_v24  ;;  %v97_v39 = vld [vmem:[#allocation5 + $0xc0] sm:$0xff]  ;;  %v99_v40 = vld [vmem:[#allocation5 + $0xd0] sm:$0xff]  ;;  %v94_v41 = vld [vmem:[#allocation5 + $0xa8] sm:$0xff] }
  0x41   :  { %171 = vmatprep.subr.mxu0 %v110_v25  ;;  %242 = vmatprep.subr.mxu1 %v112_v26  ;;  %v96_v42 = vld [vmem:[#allocation5 + $0xb8] sm:$0xff]  ;;  %v93_v43 = vld [vmem:[#allocation5 + $0xa0] sm:$0xff]  ;;  %v95_v44 = vld [vmem:[#allocation5 + $0xb0] sm:$0xff] }
  0x42   :  { %172 = vmatpush1.msra.mxu0 %v109_v27  ;;  %243 = vmatpush1.msra.mxu1 %v111_v28  ;;  %v90_v45 = vld [vmem:[#allocation5 + $0x88] sm:$0xff]  ;;  %v92_v46 = vld [vmem:[#allocation5 + $0x98] sm:$0xff]  ;;  %v89_v47 = vld [vmem:[#allocation5 + $0x80] sm:$0xff] }
  0x43   :  { %173 = vmatprep.subr.mxu0 %v106_v29  ;;  %244 = vmatprep.subr.mxu1 %v108_v30  ;;  %v91_v48 = vld [vmem:[#allocation5 + $0x90] sm:$0xff]  ;;  %v86_v49 = vld [vmem:[#allocation5 + $0x68] sm:$0xff]  ;;  %v88_v50 = vld [vmem:[#allocation5 + $0x78] sm:$0xff] }
  0x44   :  { %174 = vmatpush1.msra.mxu0 %v105_v31  ;;  %245 = vmatpush1.msra.mxu1 %v107_v32  ;;  %v85_v51 = vld [vmem:[#allocation5 + $0x60] sm:$0xff]  ;;  %v87_v52 = vld [vmem:[#allocation5 + $0x70] sm:$0xff]  ;;  %v82_v53 = vld [vmem:[#allocation5 + $0x48] sm:$0xff] }
  0x45   :  { %175 = vmatprep.subr.mxu0 %v102_v33  ;;  %246 = vmatprep.subr.mxu1 %v104_v34  ;;  %v84_v54 = vld [vmem:[#allocation5 + $0x58] sm:$0xff]  ;;  %v81_v55 = vld [vmem:[#allocation5 + $0x40] sm:$0xff]  ;;  %v83_v56 = vld [vmem:[#allocation5 + $0x50] sm:$0xff] }
  0x46   :  { %176 = vmatpush1.msra.mxu0 %v101_v35  ;;  %247 = vmatpush1.msra.mxu1 %v103_v36  ;;  %v78_v57 = vld [vmem:[#allocation5 + $0x28] sm:$0xff]  ;;  %v80_v58 = vld [vmem:[#allocation5 + $0x38] sm:$0xff]  ;;  %v77_v59 = vld [vmem:[#allocation5 + $0x20] sm:$0xff] }
  0x47   :  { %177 = vmatprep.subr.mxu0 %v98_v37  ;;  %248 = vmatprep.subr.mxu1 %v100_v38  ;;  %v79_v60 = vld [vmem:[#allocation5 + $0x30] sm:$0xff]  ;;  %v74_v61 = vld [vmem:[#allocation5 + $0x8] sm:$0xff]  ;;  %v76_v62 = vld [vmem:[#allocation5 + $0x18] sm:$0xff] }
  0x48   :  { %178 = vmatpush1.msra.mxu0 %v97_v39  ;;  %249 = vmatpush1.msra.mxu1 %v99_v40  ;;  %v73_v63 = vld [vmem:[#allocation5] sm:$0xff]  ;;  %v75_v1 = vld [vmem:[#allocation5 + $0x10] sm:$0xff]  ;;  %v72_v2 = vld [vmem:[#allocation2] sm:$0xff] }
  0x49   :  { %179 = vmatprep.subr.mxu0 %v94_v41  ;;  %250 = vmatprep.subr.mxu1 %v96_v42  ;;  %v369_v3 = vld [vmem:[#allocation8 + $0x1e8] sm:$0xff]  ;;  %v371_v4 = vld [vmem:[#allocation8 + $0x1f8] sm:$0xff]  ;;  %v368_v5 = vld [vmem:[#allocation8 + $0x1e0] sm:$0xff] }
  0x4a   :  { %180 = vmatpush1.msra.mxu0 %v93_v43  ;;  %251 = vmatpush1.msra.mxu1 %v95_v44  ;;  %v370_v6 = vld [vmem:[#allocation8 + $0x1f0] sm:$0xff]  ;;  %v365_v7 = vld [vmem:[#allocation8 + $0x1c8] sm:$0xff]  ;;  %v367_v8 = vld [vmem:[#allocation8 + $0x1d8] sm:$0xff] }
  0x4b   :  { %181 = vmatprep.subr.mxu0 %v90_v45  ;;  %252 = vmatprep.subr.mxu1 %v92_v46  ;;  %v364_v9 = vld [vmem:[#allocation8 + $0x1c0] sm:$0xff]  ;;  %v366_v10 = vld [vmem:[#allocation8 + $0x1d0] sm:$0xff]  ;;  %v361_v11 = vld [vmem:[#allocation8 + $0x1a8] sm:$0xff] }
  0x4c   :  { %182 = vmatpush1.msra.mxu0 %v89_v47  ;;  %253 = vmatpush1.msra.mxu1 %v91_v48  ;;  %v363_v12 = vld [vmem:[#allocation8 + $0x1b8] sm:$0xff]  ;;  %v360_v13 = vld [vmem:[#allocation8 + $0x1a0] sm:$0xff]  ;;  %v362_v14 = vld [vmem:[#allocation8 + $0x1b0] sm:$0xff] }
  0x4d   :  { %183 = vmatprep.subr.mxu0 %v86_v49  ;;  %254 = vmatprep.subr.mxu1 %v88_v50  ;;  %v357_v15 = vld [vmem:[#allocation8 + $0x188] sm:$0xff]  ;;  %v359_v16 = vld [vmem:[#allocation8 + $0x198] sm:$0xff]  ;;  %v356_v17 = vld [vmem:[#allocation8 + $0x180] sm:$0xff] }
  0x4e   :  { %184 = vmatpush1.msra.mxu0 %v85_v51  ;;  %255 = vmatpush1.msra.mxu1 %v87_v52  ;;  %v358_v18 = vld [vmem:[#allocation8 + $0x190] sm:$0xff]  ;;  %v353_v19 = vld [vmem:[#allocation8 + $0x168] sm:$0xff]  ;;  %v355_v20 = vld [vmem:[#allocation8 + $0x178] sm:$0xff] }
  0x4f   :  { %185 = vmatprep.subr.mxu0 %v82_v53  ;;  %256 = vmatprep.subr.mxu1 %v84_v54  ;;  %v352_v21 = vld [vmem:[#allocation8 + $0x160] sm:$0xff]  ;;  %v354_v22 = vld [vmem:[#allocation8 + $0x170] sm:$0xff]  ;;  %v349_v23 = vld [vmem:[#allocation8 + $0x148] sm:$0xff] }
  0x50   :  { %186 = vmatpush1.msra.mxu0 %v81_v55  ;;  %257 = vmatpush1.msra.mxu1 %v83_v56  ;;  %v351_v24 = vld [vmem:[#allocation8 + $0x158] sm:$0xff]  ;;  %v348_v25 = vld [vmem:[#allocation8 + $0x140] sm:$0xff]  ;;  %v350_v26 = vld [vmem:[#allocation8 + $0x150] sm:$0xff] }
  0x51   :  { %187 = vmatprep.subr.mxu0 %v78_v57  ;;  %258 = vmatprep.subr.mxu1 %v80_v58  ;;  %v345_v27 = vld [vmem:[#allocation8 + $0x128] sm:$0xff]  ;;  %v347_v28 = vld [vmem:[#allocation8 + $0x138] sm:$0xff]  ;;  %v344_v29 = vld [vmem:[#allocation8 + $0x120] sm:$0xff] }
  0x52   :  { %188 = vmatpush1.msra.mxu0 %v77_v59  ;;  %259 = vmatpush1.msra.mxu1 %v79_v60  ;;  %v346_v30 = vld [vmem:[#allocation8 + $0x130] sm:$0xff]  ;;  %v341_v31 = vld [vmem:[#allocation8 + $0x108] sm:$0xff]  ;;  %v343_v32 = vld [vmem:[#allocation8 + $0x118] sm:$0xff] }
  0x53   :  { %189 = vmatprep.subr.mxu0 %v74_v61  ;;  %260 = vmatprep.subr.mxu1 %v76_v62  ;;  %v340_v33 = vld [vmem:[#allocation8 + $0x100] sm:$0xff]  ;;  %v342_v34 = vld [vmem:[#allocation8 + $0x110] sm:$0xff]  ;;  %v337_v35 = vld [vmem:[#allocation8 + $0xe8] sm:$0xff] }
  0x54   :  { %190 = vmatpush1.msra.mxu0 %v73_v63  ;;  %261 = vmatpush1.msra.mxu1 %v75_v1  ;;  %v339_v36 = vld [vmem:[#allocation8 + $0xf8] sm:$0xff]  ;;  %v336_v37 = vld [vmem:[#allocation8 + $0xe0] sm:$0xff]  ;;  %v338_v38 = vld [vmem:[#allocation8 + $0xf0] sm:$0xff] }
  0x55   :  { %224 = vmatmul.mubr.f32.vlgmr.msra.gmra.mxu0 %v72_v2  ;;  %295 = vmatmul.mubr.f32.vlgmr.msra.gmra.mxu1 %v72_v2  ;;  %v333_v39 = vld [vmem:[#allocation8 + $0xc8] sm:$0xff]  ;;  %v335_v40 = vld [vmem:[#allocation8 + $0xd8] sm:$0xff]  ;;  %v332_v41 = vld [vmem:[#allocation8 + $0xc0] sm:$0xff] }
  0x56   :  { %394 = vmatprep.subr.mxu0 %v369_v3  ;;  %465 = vmatprep.subr.mxu1 %v371_v4  ;;  %v334_v42 = vld [vmem:[#allocation8 + $0xd0] sm:$0xff]  ;;  %v329_v43 = vld [vmem:[#allocation8 + $0xa8] sm:$0xff]  ;;  %v331_v44 = vld [vmem:[#allocation8 + $0xb8] sm:$0xff]  ;;  %v139_v3 = vlaneseq }
  0x57   :  { %395 = vmatpush1.msra.mxu0 %v368_v5  ;;  %466 = vmatpush1.msra.mxu1 %v370_v6  ;;  %v328_v45 = vld [vmem:[#allocation8 + $0xa0] sm:$0xff]  ;;  %v330_v46 = vld [vmem:[#allocation8 + $0xb0] sm:$0xff]  ;;  %v325_v47 = vld [vmem:[#allocation8 + $0x88] sm:$0xff] }
  0x58   :  { %396 = vmatprep.subr.mxu0 %v365_v7  ;;  %467 = vmatprep.subr.mxu1 %v367_v8  ;;  %v327_v48 = vld [vmem:[#allocation8 + $0x98] sm:$0xff]  ;;  %v324_v49 = vld [vmem:[#allocation8 + $0x80] sm:$0xff]  ;;  %v326_v50 = vld [vmem:[#allocation8 + $0x90] sm:$0xff]  ;;  %v140_v4 = vshrl.u32 %v139_v3, 7 }
  0x59   :  { %397 = vmatpush1.msra.mxu0 %v364_v9  ;;  %468 = vmatpush1.msra.mxu1 %v366_v10  ;;  %v321_v51 = vld [vmem:[#allocation8 + $0x68] sm:$0xff]  ;;  %v323_v52 = vld [vmem:[#allocation8 + $0x78] sm:$0xff]  ;;  %v320_v53 = vld [vmem:[#allocation8 + $0x60] sm:$0xff] }
  0x5a   :  { %398 = vmatprep.subr.mxu0 %v361_v11  ;;  %469 = vmatprep.subr.mxu1 %v363_v12  ;;  %v322_v54 = vld [vmem:[#allocation8 + $0x70] sm:$0xff]  ;;  %v319_v55 = vld [vmem:[#allocation8 + $0x58] sm:$0xff]  ;;  %v316_v56 = vld [vmem:[#allocation8 + $0x40] sm:$0xff]  ;;  %v141_v5 = vsub.s32 0, %v140_v4  ;;  %v149_v6 = vsub.s32 2, %v140_v4  ;;  %v145_v8 = vsub.s32 1, %v140_v4 }
  0x5b   :  { %399 = vmatpush1.msra.mxu0 %v360_v13  ;;  %470 = vmatpush1.msra.mxu1 %v362_v14  ;;  %v318_v57 = vld [vmem:[#allocation8 + $0x50] sm:$0xff]  ;;  %v313_v58 = vld [vmem:[#allocation8 + $0x28] sm:$0xff]  ;;  %v315_v59 = vld [vmem:[#allocation8 + $0x38] sm:$0xff]  ;;  %v153_v9 = vsub.s32 3, %v140_v4 }
  0x5c   :  { %400 = vmatprep.subr.mxu0 %v357_v15  ;;  %471 = vmatprep.subr.mxu1 %v359_v16  ;;  %v312_v60 = vld [vmem:[#allocation8 + $0x20] sm:$0xff]  ;;  %v314_v61 = vld [vmem:[#allocation8 + $0x30] sm:$0xff]  ;;  %v309_v62 = vld [vmem:[#allocation8 + $0x8] sm:$0xff] }
  0x5d   :  { %401 = vmatpush1.msra.mxu0 %v356_v17  ;;  %472 = vmatpush1.msra.mxu1 %v358_v18  ;;  %v311_v63 = vld [vmem:[#allocation8 + $0x18] sm:$0xff]  ;;  %v308_v1 = vld [vmem:[#allocation8] sm:$0xff]  ;;  %v310_v2 = vld [vmem:[#allocation8 + $0x10] sm:$0xff] }
  0x5e   :  { %402 = vmatprep.subr.mxu0 %v353_v19  ;;  %473 = vmatprep.subr.mxu1 %v355_v20  ;;  %v137_v7 = vld [vmem:[#allocation7] sm:$0xf] }
  0x5f   :  { %403 = vmatpush1.msra.mxu0 %v352_v21  ;;  %474 = vmatpush1.msra.mxu1 %v354_v22  ;;  %v142_v10 = vrot.slane %v137_v7, %v141_v5  ;;  %v150_v11 = vrot.slane %v137_v7, %v149_v6  ;;  %v146_v12 = vrot.slane %v137_v7, %v145_v8 }
  0x60   :  { %404 = vmatprep.subr.mxu0 %v349_v23  ;;  %475 = vmatprep.subr.mxu1 %v351_v24  ;;  %v154_v13 = vrot.slane %v137_v7, %v153_v9 }
  0x61   :  { %405 = vmatpush1.msra.mxu0 %v348_v25  ;;  %476 = vmatpush1.msra.mxu1 %v350_v26 }
  0x62   :  { %406 = vmatprep.subr.mxu0 %v345_v27  ;;  %477 = vmatprep.subr.mxu1 %v347_v28 }
  0x63   :  { %407 = vmatpush1.msra.mxu0 %v344_v29  ;;  %478 = vmatpush1.msra.mxu1 %v346_v30  ;;  %v372_v29 = vld [vmem:[%s777_s4] sm:$0xf]  ;;  %s714_s4 = smov [#allocation10]  }
  0x64   :  { %408 = vmatprep.subr.mxu0 %v341_v31  ;;  %479 = vmatprep.subr.mxu1 %v343_v32  ;;  %v377_v30 = vrot.slane %v372_v29, %v141_v5  ;;  %v385_v31 = vrot.slane %v372_v29, %v149_v6  ;;  %v381_v32 = vrot.slane %v372_v29, %v145_v8  ;;  %s570_s13 = sshll.u32 %s714_s4, 4  ;;  %s571_s13 = int_to_ptr.vmem [resolvable:$true] %s570_s13 }
  0x65   :  { %409 = vmatpush1.msra.mxu0 %v340_v33  ;;  %480 = vmatpush1.msra.mxu1 %v342_v34  ;;  %v389_v33 = vrot.slane %v372_v29, %v153_v9  ;;  %s679_s14 = scalar_lea.vmem %s571_s13, 128  ;;  %p684_p7 = scmp.lt.s32.totalorder %s571_s13, %s571_s13 }
  0x66   :  { %410 = vmatprep.subr.mxu0 %v337_v35  ;;  %481 = vmatprep.subr.mxu1 %v339_v36  ;;  %p680_p6 = scmp.ne.s32.totalorder %s571_s13, %s679_s14  ;;  %p685_p8 = scmp.lt.s32.totalorder %s679_s14, %s679_s14 }
  0x67   :  { %411 = vmatpush1.msra.mxu0 %v336_v37  ;;  %482 = vmatpush1.msra.mxu1 %v338_v38 }
  0x68   :  { %412 = vmatprep.subr.mxu0 %v333_v39  ;;  %483 = vmatprep.subr.mxu1 %v335_v40  ;;  %p686_p9 = por %p685_p8, %p684_p7 }
  0x69   :  { %413 = vmatpush1.msra.mxu0 %v332_v41  ;;  %484 = vmatpush1.msra.mxu1 %v334_v42 }
  0x6a   :  { %414 = vmatprep.subr.mxu0 %v329_v43  ;;  %485 = vmatprep.subr.mxu1 %v331_v44  ;;  %p687_p10 = pnand %p686_p9, %p680_p6 }
  0x6b   :  { %458 = vmatprep.mubr.f32.mxu0 %v713_v0  ;;  %529 = vmatprep.mubr.f32.mxu1 %v713_v0  ;;  %v317_v0 = vld [vmem:[#allocation8 + $0x48] sm:$0xff] }
  0x6c   :  { %415 = vmatpush1.msra.mxu0 %v328_v45  ;;  %486 = vmatpush1.msra.mxu1 %v330_v46 }
  0x6d   :  { %416 = vmatprep.subr.mxu0 %v325_v47  ;;  %487 = vmatprep.subr.mxu1 %v327_v48 }
  0x6e   :  { %417 = vmatpush1.msra.mxu0 %v324_v49  ;;  %488 = vmatpush1.msra.mxu1 %v326_v50 }
  0x6f   :  { %418 = vmatprep.subr.mxu0 %v321_v51  ;;  %489 = vmatprep.subr.mxu1 %v323_v52 }
  0x70   :  { %419 = vmatpush1.msra.mxu0 %v320_v53  ;;  %490 = vmatpush1.msra.mxu1 %v322_v54 }
  0x71   :  { %420 = vmatprep.subr.mxu0 %v317_v0  ;;  %491 = vmatprep.subr.mxu1 %v319_v55 }
  0x72   :  { %421 = vmatpush1.msra.mxu0 %v316_v56  ;;  %492 = vmatpush1.msra.mxu1 %v318_v57 }
  0x73   :  { %422 = vmatprep.subr.mxu0 %v313_v58  ;;  %493 = vmatprep.subr.mxu1 %v315_v59 }
  0x74   :  { %423 = vmatpush1.msra.mxu0 %v312_v60  ;;  %494 = vmatpush1.msra.mxu1 %v314_v61 }
  0x75   :  { %424 = vmatprep.subr.mxu0 %v309_v62  ;;  %495 = vmatprep.subr.mxu1 %v311_v63 }
  0x76   :  { %425 = vmatpush1.msra.mxu0 %v308_v1  ;;  %496 = vmatpush1.msra.mxu1 %v310_v2 }
 0x115   :  { %v225_v14 = vpop.f32.mrf.mxu0  ;;  %v296_v15 = vpop.f32.mrf.mxu1 }
 0x116   :  { %v226_v16 = vadd.f32 %v225_v14, %v142_v10  ;;  %v297_v17 = vadd.f32 %v296_v15, %v150_v11 }
 0x117   :  { %v227_v18 = vpop.f32.mrf.mxu0  ;;  %v298_v19 = vpop.f32.mrf.mxu1 }
 0x118   :  { %v228_v20 = vadd.f32 %v227_v18, %v146_v12  ;;  %v299_v21 = vadd.f32 %v298_v19, %v154_v13  ;;  %v301_v22 = vmax.f32 %v226_v16, 0.0  ;;  %v303_v23 = vmax.f32 %v297_v17, 0.0 }
 0x11a   :  { %v302_v24 = vmax.f32 %v228_v20, 0.0  ;;  %v304_v25 = vmax.f32 %v299_v21, 0.0 }
 0x11c   :  { %v305_v26 = vadd.f32 %v302_v24, %v301_v22  ;;  %v306_v27 = vadd.f32 %v304_v25, %v303_v23 }
 0x11e   :  { %v307_v28 = vadd.f32 %v306_v27, %v305_v26 }
 0x120   :  { %459 = vmatmul.mubr.f32.vlgmr.msra.gmra.mxu0 %v307_v28  ;;  %530 = vmatmul.mubr.f32.vlgmr.msra.gmra.mxu1 %v307_v28 }
 0x1e0   :  { %v460_v34 = vpop.f32.mrf.mxu0  ;;  %v531_v35 = vpop.f32.mrf.mxu1 }
 0x1e1   :  { %v461_v38 = vadd.f32 %v460_v34, %v377_v30  ;;  %v532_v39 = vadd.f32 %v531_v35, %v385_v31 }
 0x1e2   :  { %v462_v36 = vpop.f32.mrf.mxu0  ;;  %v533_v37 = vpop.f32.mrf.mxu1 }
 0x1e3   :  { %v463_v40 = vadd.f32 %v462_v36, %v381_v32  ;;  %v534_v41 = vadd.f32 %v533_v37, %v389_v33 }
 0x1e5   :  { %v536_v42 = vmax.f32 %v461_v38, %v463_v40  ;;  %v537_v43 = vmax.f32 %v532_v39, %v534_v41 }
 0x1e7   :  { %v538_v44 = vmax.f32 %v536_v42, %v537_v43 }
 0x1e9   :  { %v539_v45 = vsub.f32 %v461_v38, %v538_v44  ;;  %v542_v46 = vsub.f32 %v463_v40, %v538_v44  ;;  %v545_v47 = vsub.f32 %v532_v39, %v538_v44  ;;  %v548_v48 = vsub.f32 %v534_v41, %v538_v44 }
 0x1eb   :  { %v540_v49 = vmul.f32 1.442695, %v539_v45  ;;  %v543_v50 = vmul.f32 1.442695, %v542_v46  ;;  %v546_v51 = vmul.f32 1.442695, %v545_v47 }
 0x1ec   :  { %v549_v52 = vmul.f32 1.442695, %v548_v48 }
 0x1ed   :  { %589 = vpow2.f32 %v540_v49 }
 0x1ee   :  { %591 = vpow2.f32 %v543_v50 }
 0x1ef   :  { %593 = vpow2.f32 %v546_v51 }
 0x1f0   :  { %595 = vpow2.f32 %v549_v52 }
 0x1fa   :  { %v590_v53 = vpop.eup %589 }
 0x1fb   :  { %v592_v54 = vpop.eup %591  ;;  %v555_v59 = vmul.f32 %v590_v53, %v301_v22 }
 0x1fc   :  { %v594_v0 = vpop.eup %593  ;;  %v551_v55 = vadd.f32 %v592_v54, %v590_v53  ;;  %v556_v60 = vmul.f32 %v592_v54, %v302_v24 }
 0x1fd   :  { %v596_v56 = vpop.eup %595  ;;  %v558_v62 = vmul.f32 %v594_v0, %v303_v23 }
 0x1fe   :  { %v552_v57 = vadd.f32 %v596_v56, %v594_v0  ;;  %v557_v61 = vadd.f32 %v556_v60, %v555_v59  ;;  %v560_v1 = vmul.f32 %v596_v56, %v304_v25 }
 0x200   :  { %v553_v58 = vadd.f32 %v552_v57, %v551_v55  ;;  %v559_v63 = vadd.f32 %v558_v62, %v557_v61 }
 0x202   :  { %597 = vrcp.f32 %v553_v58  ;;  %v561_v2 = vadd.f32 %v560_v1, %v559_v63 }
 0x20f   :  { %v598_v3 = vpop.eup %597 }
 0x210   :  { %v562_v4 = vmul.f32 %v598_v3, %v561_v2 }
 0x212   :  { %563 = vst [vmem:[#allocation10] sm:$0xff] %v562_v4 }
 0x213   :  { %690 = shalt.err (!%p687_p10)
}
 0x214   :  { %573 = dma.vmem_to_hbm [thread:$0]  %s571_s13, 128, %s778_s5, [#allocation4]  }
 0x215   :  { %705 = dma.done.wait [#allocation4], 128  }
 0x216   :  { %706 = vsyncadd [#allocation4], 4294967168 }
 0x217   :  { %577 = vsyncpa [#allocation3], 1 }
 0x218   :  { %578 = vsyncpa [#allocation6], 1 }
 0x219   :  { %579 = vsyncpa [#allocation9], 1 }
 0x21a   :  { %580 = vsyncpa [#allocation4], 1 }

// kernel: tpu_custom_call.1
= control target key start
LH: loop header
LB: loop body
LE: loop exit
PB: predicated region body
PF: predicated region fallthrough
CT: control target
= control target key end

     0   :  { %10 = vsyncpa [#allocation3], 0  ;;  %s773_s0 = inlined_call_operand.hbm [shape: f32[8,128], index: 0, kind: input, shape index: {}]   ;;  %s774_s1 = inlined_call_operand.hbm [shape: f32[128,512], index: 1, kind: input, shape index: {}]   ;;  %s775_s2 = inlined_call_operand.hbm [shape: f32[1,512], index: 2, kind: input, shape index: {}]   ;;  %s776_s3 = inlined_call_operand.hbm [shape: f32[128,512], index: 3, kind: input, shape index: {}]   ;;  %s777_s4 = inlined_call_operand.vmem [shape: f32[1,512], index: 4, kind: input, shape index: {}]   ;;  %s778_s5 = inlined_call_operand.hbm [shape: f32[8,128], index: 5, kind: output, shape index: {}]  }
   0x1   :  { %11 = vsyncpa [#allocation6], 0 }
   0x2   :  { %12 = vsyncpa [#allocation9], 0 }
   0x3   :  { %13 = vsyncpa [#allocation4], 0  ;;  %s707_s18 = smov [#allocation5]  }
   0x4   :  { %s29_s19 = sshll.u32 %s707_s18, 4  ;;  %s30_s19 = int_to_ptr.vmem [resolvable:$true] %s29_s19 }
   0x5   :  { %s607_s20 = scalar_lea.vmem %s30_s19, 8192  ;;  %p612_p1 = scmp.lt.s32.totalorder %s30_s19, %s30_s19 }
   0x6   :  { %p608_p0 = scmp.ne.s32.totalorder %s30_s19, %s607_s20  ;;  %p613_p2 = scmp.lt.s32.totalorder %s607_s20, %s607_s20 }
   0x8   :  { %p614_p3 = por %p613_p2, %p612_p1 }
   0xa   :  { %p615_p4 = pnand %p614_p3, %p608_p0 }
   0xc   :  { %618 = shalt.err (!%p615_p4)
}
   0xd   :  { %s708_s21 = smov 512   ;;  %s709_s22 = smov 32  }
   0xe   :  { %35 = dma.hbm_to_vmem [thread:$0]  %s774_s1, 8192, %s30_s19, [#allocation6], %s708_s21, %s708_s21, %s709_s22  }
   0xf   :  { %s710_s25 = smov [#allocation2]   ;;  %s711_s27 = smov [#allocation7]  }
  0x10   :  { %s20_s26 = sshll.u32 %s710_s25, 4  ;;  %s42_s28 = sshll.u32 %s711_s27, 4  ;;  %s21_s26 = int_to_ptr.vmem [resolvable:$true] %s20_s26  ;;  %s43_s28 = int_to_ptr.vmem [resolvable:$true] %s42_s28 }
  0x11   :  { %s627_s29 = scalar_lea.vmem %s21_s26, 128  ;;  %p632_p6 = scmp.lt.s32.totalorder %s21_s26, %s21_s26 }
  0x12   :  { %p628_p5 = scmp.ne.s32.totalorder %s21_s26, %s627_s29  ;;  %p633_p7 = scmp.lt.s32.totalorder %s627_s29, %s627_s29 }
  0x14   :  { %p634_p8 = por %p633_p7, %p632_p6 }
  0x16   :  { %p635_p9 = pnand %p634_p8, %p628_p5 }
  0x18   :  { %638 = shalt.err (!%p635_p9)
}
  0x19   :  { %23 = dma.hbm_to_vmem [thread:$0]  %s773_s0, 128, %s21_s26, [#allocation3]  }
  0x1a   :  { %s647_s7 = scalar_lea.vmem %s43_s28, 64  ;;  %p652_p11 = scmp.lt.s32.totalorder %s43_s28, %s43_s28 }
  0x1b   :  { %p648_p10 = scmp.ne.s32.totalorder %s43_s28, %s647_s7  ;;  %p653_p12 = scmp.lt.s32.totalorder %s647_s7, %s647_s7 }
  0x1d   :  { %p654_p13 = por %p653_p12, %p652_p11 }
  0x1f   :  { %p655_p0 = pnand %p654_p13, %p648_p10 }
  0x21   :  { %658 = shalt.err (!%p655_p0)
}
  0x22   :  { %45 = dma.hbm_to_vmem [thread:$0]  %s775_s2, 64, %s43_s28, [#allocation6]  }
  0x23   :  { %s712_s9 = smov [#allocation8]  }
  0x24   :  { %s51_s10 = sshll.u32 %s712_s9, 4  ;;  %s52_s10 = int_to_ptr.vmem [resolvable:$true] %s51_s10 }
  0x25   :  { %s667_s11 = scalar_lea.vmem %s52_s10, 8192  ;;  %p672_p2 = scmp.lt.s32.totalorder %s52_s10, %s52_s10 }
  0x26   :  { %p668_p1 = scmp.ne.s32.totalorder %s52_s10, %s667_s11  ;;  %p673_p3 = scmp.lt.s32.totalorder %s667_s11, %s667_s11 }
  0x28   :  { %p674_p4 = por %p673_p3, %p672_p2 }
  0x2a   :  { %p675_p5 = pnand %p674_p4, %p668_p1 }
  0x2c   :  { %678 = shalt.err (!%p675_p5)
}
  0x2d   :  { %57 = dma.hbm_to_vmem [thread:$0]  %s776_s3, 8192, %s52_s10, [#allocation9], %s708_s21, %s708_s21, %s709_s22  }
  0x2e   :  { %699 = dma.done.wait [#allocation3], 128  }
  0x2f   :  { %700 = vsyncadd [#allocation3], 4294967168 }
  0x30   :  { %701 = dma.done.wait [#allocation6], 8256  }
  0x31   :  { %702 = vsyncadd [#allocation6], 4294959040 }
  0x32   :  { %703 = dma.done.wait [#allocation9], 8192  }
  0x33   :  { %704 = vsyncadd [#allocation9], 4294959104  ;;  %v713_v0 = vmov 0.0   ;;  %v134_v1 = vld [vmem:[#allocation5 + $0x1e8] sm:$0xff]  ;;  %v136_v2 = vld [vmem:[#allocation5 + $0x1f8] sm:$0xff] }
  0x34   :  { %223 = vmatprep.mubr.f32.mxu0 %v713_v0  ;;  %294 = vmatprep.mubr.f32.mxu1 %v713_v0  ;;  %v133_v3 = vld [vmem:[#allocation5 + $0x1e0] sm:$0xff]  ;;  %v135_v4 = vld [vmem:[#allocation5 + $0x1f0] sm:$0xff]  ;;  %v130_v5 = vld [vmem:[#allocation5 + $0x1c8] sm:$0xff] }
  0x35   :  { %159 = vmatprep.subr.mxu0 %v134_v1  ;;  %230 = vmatprep.subr.mxu1 %v136_v2  ;;  %v132_v6 = vld [vmem:[#allocation5 + $0x1d8] sm:$0xff]  ;;  %v129_v7 = vld [vmem:[#allocation5 + $0x1c0] sm:$0xff]  ;;  %v131_v8 = vld [vmem:[#allocation5 + $0x1d0] sm:$0xff] }
  0x36   :  { %160 = vmatpush1.msra.mxu0 %v133_v3  ;;  %231 = vmatpush1.msra.mxu1 %v135_v4  ;;  %v126_v9 = vld [vmem:[#allocation5 + $0x1a8] sm:$0xff]  ;;  %v128_v10 = vld [vmem:[#allocation5 + $0x1b8] sm:$0xff]  ;;  %v125_v11 = vld [vmem:[#allocation5 + $0x1a0] sm:$0xff] }
  0x37   :  { %161 = vmatprep.subr.mxu0 %v130_v5  ;;  %232 = vmatprep.subr.mxu1 %v132_v6  ;;  %v127_v12 = vld [vmem:[#allocation5 + $0x1b0] sm:$0xff]  ;;  %v122_v13 = vld [vmem:[#allocation5 + $0x188] sm:$0xff]  ;;  %v124_v14 = vld [vmem:[#allocation5 + $0x198] sm:$0xff] }
  0x38   :  { %162 = vmatpush1.msra.mxu0 %v129_v7  ;;  %233 = vmatpush1.msra.mxu1 %v131_v8  ;;  %v121_v15 = vld [vmem:[#allocation5 + $0x180] sm:$0xff]  ;;  %v123_v16 = vld [vmem:[#allocation5 + $0x190] sm:$0xff]  ;;  %v118_v17 = vld [vmem:[#allocation5 + $0x168] sm:$0xff] }
  0x39   :  { %163 = vmatprep.subr.mxu0 %v126_v9  ;;  %234 = vmatprep.subr.mxu1 %v128_v10  ;;  %v120_v18 = vld [vmem:[#allocation5 + $0x178] sm:$0xff]  ;;  %v117_v19 = vld [vmem:[#allocation5 + $0x160] sm:$0xff]  ;;  %v119_v20 = vld [vmem:[#allocation5 + $0x170] sm:$0xff] }
  0x3a   :  { %164 = vmatpush1.msra.mxu0 %v125_v11  ;;  %235 = vmatpush1.msra.mxu1 %v127_v12  ;;  %v114_v21 = vld [vmem:[#allocation5 + $0x148] sm:$0xff]  ;;  %v116_v22 = vld [vmem:[#allocation5 + $0x158] sm:$0xff]  ;;  %v113_v23 = vld [vmem:[#allocation5 + $0x140] sm:$0xff] }
  0x3b   :  { %165 = vmatprep.subr.mxu0 %v122_v13  ;;  %236 = vmatprep.subr.mxu1 %v124_v14  ;;  %v115_v24 = vld [vmem:[#allocation5 + $0x150] sm:$0xff]  ;;  %v110_v25 = vld [vmem:[#allocation5 + $0x128] sm:$0xff]  ;;  %v112_v26 = vld [vmem:[#allocation5 + $0x138] sm:$0xff] }
  0x3c   :  { %166 = vmatpush1.msra.mxu0 %v121_v15  ;;  %237 = vmatpush1.msra.mxu1 %v123_v16  ;;  %v109_v27 = vld [vmem:[#allocation5 + $0x120] sm:$0xff]  ;;  %v111_v28 = vld [vmem:[#allocation5 + $0x130] sm:$0xff]  ;;  %v106_v29 = vld [vmem:[#allocation5 + $0x108] sm:$0xff] }
  0x3d   :  { %167 = vmatprep.subr.mxu0 %v118_v17  ;;  %238 = vmatprep.subr.mxu1 %v120_v18  ;;  %v108_v30 = vld [vmem:[#allocation5 + $0x118] sm:$0xff]  ;;  %v105_v31 = vld [vmem:[#allocation5 + $0x100] sm:$0xff]  ;;  %v107_v32 = vld [vmem:[#allocation5 + $0x110] sm:$0xff] }
  0x3e   :  { %168 = vmatpush1.msra.mxu0 %v117_v19  ;;  %239 = vmatpush1.msra.mxu1 %v119_v20  ;;  %v102_v33 = vld [vmem:[#allocation5 + $0xe8] sm:$0xff]  ;;  %v104_v34 = vld [vmem:[#allocation5 + $0xf8] sm:$0xff]  ;;  %v101_v35 = vld [vmem:[#allocation5 + $0xe0] sm:$0xff] }
  0x3f   :  { %169 = vmatprep.subr.mxu0 %v114_v21  ;;  %240 = vmatprep.subr.mxu1 %v116_v22  ;;  %v103_v36 = vld [vmem:[#allocation5 + $0xf0] sm:$0xff]  ;;  %v98_v37 = vld [vmem:[#allocation5 + $0xc8] sm:$0xff]  ;;  %v100_v38 = vld [vmem:[#allocation5 + $0xd8] sm:$0xff] }
  0x40   :  { %170 = vmatpush1.msra.mxu0 %v113_v23  ;;  %241 = vmatpush1.msra.mxu1 %v115_v24  ;;  %v97_v39 = vld [vmem:[#allocation5 + $0xc0] sm:$0xff]  ;;  %v99_v40 = vld [vmem:[#allocation5 + $0xd0] sm:$0xff]  ;;  %v94_v41 = vld [vmem:[#allocation5 + $0xa8] sm:$0xff] }
  0x41   :  { %171 = vmatprep.subr.mxu0 %v110_v25  ;;  %242 = vmatprep.subr.mxu1 %v112_v26  ;;  %v96_v42 = vld [vmem:[#allocation5 + $0xb8] sm:$0xff]  ;;  %v93_v43 = vld [vmem:[#allocation5 + $0xa0] sm:$0xff]  ;;  %v95_v44 = vld [vmem:[#allocation5 + $0xb0] sm:$0xff] }
  0x42   :  { %172 = vmatpush1.msra.mxu0 %v109_v27  ;;  %243 = vmatpush1.msra.mxu1 %v111_v28  ;;  %v90_v45 = vld [vmem:[#allocation5 + $0x88] sm:$0xff]  ;;  %v92_v46 = vld [vmem:[#allocation5 + $0x98] sm:$0xff]  ;;  %v89_v47 = vld [vmem:[#allocation5 + $0x80] sm:$0xff] }
  0x43   :  { %173 = vmatprep.subr.mxu0 %v106_v29  ;;  %244 = vmatprep.subr.mxu1 %v108_v30  ;;  %v91_v48 = vld [vmem:[#allocation5 + $0x90] sm:$0xff]  ;;  %v86_v49 = vld [vmem:[#allocation5 + $0x68] sm:$0xff]  ;;  %v88_v50 = vld [vmem:[#allocation5 + $0x78] sm:$0xff] }
  0x44   :  { %174 = vmatpush1.msra.mxu0 %v105_v31  ;;  %245 = vmatpush1.msra.mxu1 %v107_v32  ;;  %v85_v51 = vld [vmem:[#allocation5 + $0x60] sm:$0xff]  ;;  %v87_v52 = vld [vmem:[#allocation5 + $0x70] sm:$0xff]  ;;  %v82_v53 = vld [vmem:[#allocation5 + $0x48] sm:$0xff] }
  0x45   :  { %175 = vmatprep.subr.mxu0 %v102_v33  ;;  %246 = vmatprep.subr.mxu1 %v104_v34  ;;  %v84_v54 = vld [vmem:[#allocation5 + $0x58] sm:$0xff]  ;;  %v81_v55 = vld [vmem:[#allocation5 + $0x40] sm:$0xff]  ;;  %v83_v56 = vld [vmem:[#allocation5 + $0x50] sm:$0xff] }
  0x46   :  { %176 = vmatpush1.msra.mxu0 %v101_v35  ;;  %247 = vmatpush1.msra.mxu1 %v103_v36  ;;  %v78_v57 = vld [vmem:[#allocation5 + $0x28] sm:$0xff]  ;;  %v80_v58 = vld [vmem:[#allocation5 + $0x38] sm:$0xff]  ;;  %v77_v59 = vld [vmem:[#allocation5 + $0x20] sm:$0xff] }
  0x47   :  { %177 = vmatprep.subr.mxu0 %v98_v37  ;;  %248 = vmatprep.subr.mxu1 %v100_v38  ;;  %v79_v60 = vld [vmem:[#allocation5 + $0x30] sm:$0xff]  ;;  %v74_v61 = vld [vmem:[#allocation5 + $0x8] sm:$0xff]  ;;  %v76_v62 = vld [vmem:[#allocation5 + $0x18] sm:$0xff] }
  0x48   :  { %178 = vmatpush1.msra.mxu0 %v97_v39  ;;  %249 = vmatpush1.msra.mxu1 %v99_v40  ;;  %v73_v63 = vld [vmem:[#allocation5] sm:$0xff]  ;;  %v75_v1 = vld [vmem:[#allocation5 + $0x10] sm:$0xff]  ;;  %v72_v2 = vld [vmem:[#allocation2] sm:$0xff] }
  0x49   :  { %179 = vmatprep.subr.mxu0 %v94_v41  ;;  %250 = vmatprep.subr.mxu1 %v96_v42  ;;  %v369_v3 = vld [vmem:[#allocation8 + $0x1e8] sm:$0xff]  ;;  %v371_v4 = vld [vmem:[#allocation8 + $0x1f8] sm:$0xff]  ;;  %v368_v5 = vld [vmem:[#allocation8 + $0x1e0] sm:$0xff] }
  0x4a   :  { %180 = vmatpush1.msra.mxu0 %v93_v43  ;;  %251 = vmatpush1.msra.mxu1 %v95_v44  ;;  %v370_v6 = vld [vmem:[#allocation8 + $0x1f0] sm:$0xff]  ;;  %v365_v7 = vld [vmem:[#allocation8 + $0x1c8] sm:$0xff]  ;;  %v367_v8 = vld [vmem:[#allocation8 + $0x1d8] sm:$0xff] }
  0x4b   :  { %181 = vmatprep.subr.mxu0 %v90_v45  ;;  %252 = vmatprep.subr.mxu1 %v92_v46  ;;  %v364_v9 = vld [vmem:[#allocation8 + $0x1c0] sm:$0xff]  ;;  %v366_v10 = vld [vmem:[#allocation8 + $0x1d0] sm:$0xff]  ;;  %v361_v11 = vld [vmem:[#allocation8 + $0x1a8] sm:$0xff] }
  0x4c   :  { %182 = vmatpush1.msra.mxu0 %v89_v47  ;;  %253 = vmatpush1.msra.mxu1 %v91_v48  ;;  %v363_v12 = vld [vmem:[#allocation8 + $0x1b8] sm:$0xff]  ;;  %v360_v13 = vld [vmem:[#allocation8 + $0x1a0] sm:$0xff]  ;;  %v362_v14 = vld [vmem:[#allocation8 + $0x1b0] sm:$0xff] }
  0x4d   :  { %183 = vmatprep.subr.mxu0 %v86_v49  ;;  %254 = vmatprep.subr.mxu1 %v88_v50  ;;  %v357_v15 = vld [vmem:[#allocation8 + $0x188] sm:$0xff]  ;;  %v359_v16 = vld [vmem:[#allocation8 + $0x198] sm:$0xff]  ;;  %v356_v17 = vld [vmem:[#allocation8 + $0x180] sm:$0xff] }
  0x4e   :  { %184 = vmatpush1.msra.mxu0 %v85_v51  ;;  %255 = vmatpush1.msra.mxu1 %v87_v52  ;;  %v358_v18 = vld [vmem:[#allocation8 + $0x190] sm:$0xff]  ;;  %v353_v19 = vld [vmem:[#allocation8 + $0x168] sm:$0xff]  ;;  %v355_v20 = vld [vmem:[#allocation8 + $0x178] sm:$0xff] }
  0x4f   :  { %185 = vmatprep.subr.mxu0 %v82_v53  ;;  %256 = vmatprep.subr.mxu1 %v84_v54  ;;  %v352_v21 = vld [vmem:[#allocation8 + $0x160] sm:$0xff]  ;;  %v354_v22 = vld [vmem:[#allocation8 + $0x170] sm:$0xff]  ;;  %v349_v23 = vld [vmem:[#allocation8 + $0x148] sm:$0xff] }
  0x50   :  { %186 = vmatpush1.msra.mxu0 %v81_v55  ;;  %257 = vmatpush1.msra.mxu1 %v83_v56  ;;  %v351_v24 = vld [vmem:[#allocation8 + $0x158] sm:$0xff]  ;;  %v348_v25 = vld [vmem:[#allocation8 + $0x140] sm:$0xff]  ;;  %v350_v26 = vld [vmem:[#allocation8 + $0x150] sm:$0xff] }
  0x51   :  { %187 = vmatprep.subr.mxu0 %v78_v57  ;;  %258 = vmatprep.subr.mxu1 %v80_v58  ;;  %v345_v27 = vld [vmem:[#allocation8 + $0x128] sm:$0xff]  ;;  %v347_v28 = vld [vmem:[#allocation8 + $0x138] sm:$0xff]  ;;  %v344_v29 = vld [vmem:[#allocation8 + $0x120] sm:$0xff] }
  0x52   :  { %188 = vmatpush1.msra.mxu0 %v77_v59  ;;  %259 = vmatpush1.msra.mxu1 %v79_v60  ;;  %v346_v30 = vld [vmem:[#allocation8 + $0x130] sm:$0xff]  ;;  %v341_v31 = vld [vmem:[#allocation8 + $0x108] sm:$0xff]  ;;  %v343_v32 = vld [vmem:[#allocation8 + $0x118] sm:$0xff] }
  0x53   :  { %189 = vmatprep.subr.mxu0 %v74_v61  ;;  %260 = vmatprep.subr.mxu1 %v76_v62  ;;  %v340_v33 = vld [vmem:[#allocation8 + $0x100] sm:$0xff]  ;;  %v342_v34 = vld [vmem:[#allocation8 + $0x110] sm:$0xff]  ;;  %v337_v35 = vld [vmem:[#allocation8 + $0xe8] sm:$0xff] }
  0x54   :  { %190 = vmatpush1.msra.mxu0 %v73_v63  ;;  %261 = vmatpush1.msra.mxu1 %v75_v1  ;;  %v339_v36 = vld [vmem:[#allocation8 + $0xf8] sm:$0xff]  ;;  %v336_v37 = vld [vmem:[#allocation8 + $0xe0] sm:$0xff]  ;;  %v338_v38 = vld [vmem:[#allocation8 + $0xf0] sm:$0xff] }
  0x55   :  { %224 = vmatmul.mubr.f32.vlgmr.msra.gmra.mxu0 %v72_v2  ;;  %295 = vmatmul.mubr.f32.vlgmr.msra.gmra.mxu1 %v72_v2  ;;  %v333_v39 = vld [vmem:[#allocation8 + $0xc8] sm:$0xff]  ;;  %v335_v40 = vld [vmem:[#allocation8 + $0xd8] sm:$0xff]  ;;  %v332_v41 = vld [vmem:[#allocation8 + $0xc0] sm:$0xff] }
  0x56   :  { %394 = vmatprep.subr.mxu0 %v369_v3  ;;  %465 = vmatprep.subr.mxu1 %v371_v4  ;;  %v334_v42 = vld [vmem:[#allocation8 + $0xd0] sm:$0xff]  ;;  %v329_v43 = vld [vmem:[#allocation8 + $0xa8] sm:$0xff]  ;;  %v331_v44 = vld [vmem:[#allocation8 + $0xb8] sm:$0xff]  ;;  %v139_v3 = vlaneseq }
  0x57   :  { %395 = vmatpush1.msra.mxu0 %v368_v5  ;;  %466 = vmatpush1.msra.mxu1 %v370_v6  ;;  %v328_v45 = vld [vmem:[#allocation8 + $0xa0] sm:$0xff]  ;;  %v330_v46 = vld [vmem:[#allocation8 + $0xb0] sm:$0xff]  ;;  %v325_v47 = vld [vmem:[#allocation8 + $0x88] sm:$0xff] }
  0x58   :  { %396 = vmatprep.subr.mxu0 %v365_v7  ;;  %467 = vmatprep.subr.mxu1 %v367_v8  ;;  %v327_v48 = vld [vmem:[#allocation8 + $0x98] sm:$0xff]  ;;  %v324_v49 = vld [vmem:[#allocation8 + $0x80] sm:$0xff]  ;;  %v326_v50 = vld [vmem:[#allocation8 + $0x90] sm:$0xff]  ;;  %v140_v4 = vshrl.u32 %v139_v3, 7 }
  0x59   :  { %397 = vmatpush1.msra.mxu0 %v364_v9  ;;  %468 = vmatpush1.msra.mxu1 %v366_v10  ;;  %v321_v51 = vld [vmem:[#allocation8 + $0x68] sm:$0xff]  ;;  %v323_v52 = vld [vmem:[#allocation8 + $0x78] sm:$0xff]  ;;  %v320_v53 = vld [vmem:[#allocation8 + $0x60] sm:$0xff] }
  0x5a   :  { %398 = vmatprep.subr.mxu0 %v361_v11  ;;  %469 = vmatprep.subr.mxu1 %v363_v12  ;;  %v322_v54 = vld [vmem:[#allocation8 + $0x70] sm:$0xff]  ;;  %v319_v55 = vld [vmem:[#allocation8 + $0x58] sm:$0xff]  ;;  %v316_v56 = vld [vmem:[#allocation8 + $0x40] sm:$0xff]  ;;  %v141_v5 = vsub.s32 0, %v140_v4  ;;  %v149_v6 = vsub.s32 2, %v140_v4  ;;  %v145_v8 = vsub.s32 1, %v140_v4 }
  0x5b   :  { %399 = vmatpush1.msra.mxu0 %v360_v13  ;;  %470 = vmatpush1.msra.mxu1 %v362_v14  ;;  %v318_v57 = vld [vmem:[#allocation8 + $0x50] sm:$0xff]  ;;  %v313_v58 = vld [vmem:[#allocation8 + $0x28] sm:$0xff]  ;;  %v315_v59 = vld [vmem:[#allocation8 + $0x38] sm:$0xff]  ;;  %v153_v9 = vsub.s32 3, %v140_v4 }
  0x5c   :  { %400 = vmatprep.subr.mxu0 %v357_v15  ;;  %471 = vmatprep.subr.mxu1 %v359_v16  ;;  %v312_v60 = vld [vmem:[#allocation8 + $0x20] sm:$0xff]  ;;  %v314_v61 = vld [vmem:[#allocation8 + $0x30] sm:$0xff]  ;;  %v309_v62 = vld [vmem:[#allocation8 + $0x8] sm:$0xff] }
  0x5d   :  { %401 = vmatpush1.msra.mxu0 %v356_v17  ;;  %472 = vmatpush1.msra.mxu1 %v358_v18  ;;  %v311_v63 = vld [vmem:[#allocation8 + $0x18] sm:$0xff]  ;;  %v308_v1 = vld [vmem:[#allocation8] sm:$0xff]  ;;  %v310_v2 = vld [vmem:[#allocation8 + $0x10] sm:$0xff] }
  0x5e   :  { %402 = vmatprep.subr.mxu0 %v353_v19  ;;  %473 = vmatprep.subr.mxu1 %v355_v20  ;;  %v137_v7 = vld [vmem:[#allocation7] sm:$0xf] }
  0x5f   :  { %403 = vmatpush1.msra.mxu0 %v352_v21  ;;  %474 = vmatpush1.msra.mxu1 %v354_v22  ;;  %v142_v10 = vrot.slane %v137_v7, %v141_v5  ;;  %v150_v11 = vrot.slane %v137_v7, %v149_v6  ;;  %v146_v12 = vrot.slane %v137_v7, %v145_v8 }
  0x60   :  { %404 = vmatprep.subr.mxu0 %v349_v23  ;;  %475 = vmatprep.subr.mxu1 %v351_v24  ;;  %v154_v13 = vrot.slane %v137_v7, %v153_v9 }
  0x61   :  { %405 = vmatpush1.msra.mxu0 %v348_v25  ;;  %476 = vmatpush1.msra.mxu1 %v350_v26 }
  0x62   :  { %406 = vmatprep.subr.mxu0 %v345_v27  ;;  %477 = vmatprep.subr.mxu1 %v347_v28 }
  0x63   :  { %407 = vmatpush1.msra.mxu0 %v344_v29  ;;  %478 = vmatpush1.msra.mxu1 %v346_v30  ;;  %v372_v29 = vld [vmem:[%s777_s4] sm:$0xf]  ;;  %s714_s4 = smov [#allocation10]  }
  0x64   :  { %408 = vmatprep.subr.mxu0 %v341_v31  ;;  %479 = vmatprep.subr.mxu1 %v343_v32  ;;  %v377_v30 = vrot.slane %v372_v29, %v141_v5  ;;  %v385_v31 = vrot.slane %v372_v29, %v149_v6  ;;  %v381_v32 = vrot.slane %v372_v29, %v145_v8  ;;  %s570_s13 = sshll.u32 %s714_s4, 4  ;;  %s571_s13 = int_to_ptr.vmem [resolvable:$true] %s570_s13 }
  0x65   :  { %409 = vmatpush1.msra.mxu0 %v340_v33  ;;  %480 = vmatpush1.msra.mxu1 %v342_v34  ;;  %v389_v33 = vrot.slane %v372_v29, %v153_v9  ;;  %s679_s14 = scalar_lea.vmem %s571_s13, 128  ;;  %p684_p7 = scmp.lt.s32.totalorder %s571_s13, %s571_s13 }
  0x66   :  { %410 = vmatprep.subr.mxu0 %v337_v35  ;;  %481 = vmatprep.subr.mxu1 %v339_v36  ;;  %p680_p6 = scmp.ne.s32.totalorder %s571_s13, %s679_s14  ;;  %p685_p8 = scmp.lt.s32.totalorder %s679_s14, %s679_s14 }
  0x67   :  { %411 = vmatpush1.msra.mxu0 %v336_v37  ;;  %482 = vmatpush1.msra.mxu1 %v338_v38 }
  0x68   :  { %412 = vmatprep.subr.mxu0 %v333_v39  ;;  %483 = vmatprep.subr.mxu1 %v335_v40  ;;  %p686_p9 = por %p685_p8, %p684_p7 }
  0x69   :  { %413 = vmatpush1.msra.mxu0 %v332_v41  ;;  %484 = vmatpush1.msra.mxu1 %v334_v42 }
  0x6a   :  { %414 = vmatprep.subr.mxu0 %v329_v43  ;;  %485 = vmatprep.subr.mxu1 %v331_v44  ;;  %p687_p10 = pnand %p686_p9, %p680_p6 }
  0x6b   :  { %458 = vmatprep.mubr.f32.mxu0 %v713_v0  ;;  %529 = vmatprep.mubr.f32.mxu1 %v713_v0  ;;  %v317_v0 = vld [vmem:[#allocation8 + $0x48] sm:$0xff] }
  0x6c   :  { %415 = vmatpush1.msra.mxu0 %v328_v45  ;;  %486 = vmatpush1.msra.mxu1 %v330_v46 }
  0x6d   :  { %416 = vmatprep.subr.mxu0 %v325_v47  ;;  %487 = vmatprep.subr.mxu1 %v327_v48 }
  0x6e   :  { %417 = vmatpush1.msra.mxu0 %v324_v49  ;;  %488 = vmatpush1.msra.mxu1 %v326_v50 }
  0x6f   :  { %418 = vmatprep.subr.mxu0 %v321_v51  ;;  %489 = vmatprep.subr.mxu1 %v323_v52 }
  0x70   :  { %419 = vmatpush1.msra.mxu0 %v320_v53  ;;  %490 = vmatpush1.msra.mxu1 %v322_v54 }
  0x71   :  { %420 = vmatprep.subr.mxu0 %v317_v0  ;;  %491 = vmatprep.subr.mxu1 %v319_v55 }
  0x72   :  { %421 = vmatpush1.msra.mxu0 %v316_v56  ;;  %492 = vmatpush1.msra.mxu1 %v318_v57 }
  0x73   :  { %422 = vmatprep.subr.mxu0 %v313_v58  ;;  %493 = vmatprep.subr.mxu1 %v315_v59 }
  0x74   :  { %423 = vmatpush1.msra.mxu0 %v312_v60  ;;  %494 = vmatpush1.msra.mxu1 %v314_v61 }
  0x75   :  { %424 = vmatprep.subr.mxu0 %v309_v62  ;;  %495 = vmatprep.subr.mxu1 %v311_v63 }
  0x76   :  { %425 = vmatpush1.msra.mxu0 %v308_v1  ;;  %496 = vmatpush1.msra.mxu1 %v310_v2 }
 0x115   :  { %v225_v14 = vpop.f32.mrf.mxu0  ;;  %v296_v15 = vpop.f32.mrf.mxu1 }
 0x116   :  { %v226_v16 = vadd.f32 %v225_v14, %v142_v10  ;;  %v297_v17 = vadd.f32 %v296_v15, %v150_v11 }
 0x117   :  { %v227_v18 = vpop.f32.mrf.mxu0  ;;  %v298_v19 = vpop.f32.mrf.mxu1 }
 0x118   :  { %v228_v20 = vadd.f32 %v227_v18, %v146_v12  ;;  %v299_v21 = vadd.f32 %v298_v19, %v154_v13  ;;  %v301_v22 = vmax.f32 %v226_v16, 0.0  ;;  %v303_v23 = vmax.f32 %v297_v17, 0.0 }
 0x11a   :  { %v302_v24 = vmax.f32 %v228_v20, 0.0  ;;  %v304_v25 = vmax.f32 %v299_v21, 0.0 }
 0x11c   :  { %v305_v26 = vadd.f32 %v302_v24, %v301_v22  ;;  %v306_v27 = vadd.f32 %v304_v25, %v303_v23 }
 0x11e   :  { %v307_v28 = vadd.f32 %v306_v27, %v305_v26 }
 0x120   :  { %459 = vmatmul.mubr.f32.vlgmr.msra.gmra.mxu0 %v307_v28  ;;  %530 = vmatmul.mubr.f32.vlgmr.msra.gmra.mxu1 %v307_v28 }
 0x1e0   :  { %v460_v34 = vpop.f32.mrf.mxu0  ;;  %v531_v35 = vpop.f32.mrf.mxu1 }
 0x1e1   :  { %v461_v38 = vadd.f32 %v460_v34, %v377_v30  ;;  %v532_v39 = vadd.f32 %v531_v35, %v385_v31 }
 0x1e2   :  { %v462_v36 = vpop.f32.mrf.mxu0  ;;  %v533_v37 = vpop.f32.mrf.mxu1 }
 0x1e3   :  { %v463_v40 = vadd.f32 %v462_v36, %v381_v32  ;;  %v534_v41 = vadd.f32 %v533_v37, %v389_v33 }
 0x1e5   :  { %v536_v42 = vmax.f32 %v461_v38, %v463_v40  ;;  %v537_v43 = vmax.f32 %v532_v39, %v534_v41 }
 0x1e7   :  { %v538_v44 = vmax.f32 %v536_v42, %v537_v43 }
 0x1e9   :  { %v539_v45 = vsub.f32 %v461_v38, %v538_v44  ;;  %v542_v46 = vsub.f32 %v463_v40, %v538_v44  ;;  %v545_v47 = vsub.f32 %v532_v39, %v538_v44  ;;  %v548_v48 = vsub.f32 %v534_v41, %v538_v44 }
 0x1eb   :  { %v540_v49 = vmul.f32 1.442695, %v539_v45  ;;  %v543_v50 = vmul.f32 1.442695, %v542_v46  ;;  %v546_v51 = vmul.f32 1.442695, %v545_v47 }
 0x1ec   :  { %v549_v52 = vmul.f32 1.442695, %v548_v48 }
 0x1ed   :  { %589 = vpow2.f32 %v540_v49 }
 0x1ee   :  { %591 = vpow2.f32 %v543_v50 }
 0x1ef   :  { %593 = vpow2.f32 %v546_v51 }
 0x1f0   :  { %595 = vpow2.f32 %v549_v52 }
 0x1fa   :  { %v590_v53 = vpop.eup %589 }
 0x1fb   :  { %v592_v54 = vpop.eup %591  ;;  %v555_v59 = vmul.f32 %v590_v53, %v301_v22 }
 0x1fc   :  { %v594_v0 = vpop.eup %593  ;;  %v551_v55 = vadd.f32 %v592_v54, %v590_v53  ;;  %v556_v60 = vmul.f32 %v592_v54, %v302_v24 }
 0x1fd   :  { %v596_v56 = vpop.eup %595  ;;  %v558_v62 = vmul.f32 %v594_v0, %v303_v23 }
 0x1fe   :  { %v552_v57 = vadd.f32 %v596_v56, %v594_v0  ;;  %v557_v61 = vadd.f32 %v556_v60, %v555_v59  ;;  %v560_v1 = vmul.f32 %v596_v56, %v304_v25 }
 0x200   :  { %v553_v58 = vadd.f32 %v552_v57, %v551_v55  ;;  %v559_v63 = vadd.f32 %v558_v62, %v557_v61 }
 0x202   :  { %597 = vrcp.f32 %v553_v58  ;;  %v561_v2 = vadd.f32 %v560_v1, %v559_v63 }
 0x20f   :  { %v598_v3 = vpop.eup %597 }
 0x210   :  { %v562_v4 = vmul.f32 %v598_v3, %v561_v2 }
 0x212   :  { %563 = vst [vmem:[#allocation10] sm:$0xff] %v562_v4 }
 0x213   :  { %690 = shalt.err (!%p687_p10)
}
 0x214   :  { %573 = dma.vmem_to_hbm [thread:$0]  %s571_s13, 128, %s778_s5, [#allocation4]  }
 0x215   :  { %705 = dma.done.wait [#allocation4], 128  }
 0x216   :  { %706 = vsyncadd [#allocation4], 4294967168 }
 0x217   :  { %577 = vsyncpa [#allocation3], 1 }
 0x218   :  { %578 = vsyncpa [#allocation6], 1 }
 0x219   :  { %579 = vsyncpa [#allocation9], 1 }
 0x21a   :  { %580 = vsyncpa [#allocation4], 1 }

</bundles_post_ra>
